<compile_context>
chip_gen: v7x
topology: tpu7x:2x2x1
jax: 0.10.0
libtpu: 0.0.40
codegen_flags: <defaults>
</compile_context>

<pallas_src>
import functools
from typing import NamedTuple

import jax
import jax.numpy as jnp
from jax.experimental import pallas as pl
from jax.experimental.pallas import tpu as pltpu


def _chip_kind():
    try:
        return jax.devices()[0].device_kind.lower()
    except Exception:  # pragma: no cover
        return ""


_IS_V5 = "v5" in _chip_kind()
_NB = 128 if _IS_V5 else 256        # gaussian block (MXU-native tile)
_ELEM_DTYPE = jnp.float32 if _IS_V5 else jnp.bfloat16
_MAX_TILE_P = 1024                  # pixel-lane tile
_LOG_EPS = -30.0                    # finite stand-in for log(0)


def _round_up(x, m):
    return ((x + m - 1) // m) * m


# ----------------------------------------------------------------------------
# Pallas kernel
# ----------------------------------------------------------------------------
def _raster_kernel(pix_ref, gp_ref, om_ref, ltri_ref, out_ref, logt_ref, *, cdt):
    b = pl.program_id(1)

    @pl.when(b == 0)
    def _init():
        out_ref[...] = jnp.zeros_like(out_ref)
        logt_ref[...] = jnp.zeros_like(logt_ref)

    px = pix_ref[0:1, :]                      # (1, TILE) f32 pixel centers x
    py = pix_ref[1:2, :]                      # (1, TILE) f32 pixel centers y

    mx = gp_ref[:, 0:1]                       # (Nb, 1) f32
    my = gp_ref[:, 1:2]
    log_opac = gp_ref[:, 2:3].astype(cdt)     # log(opacity), clamped finite
    nisig = gp_ref[:, 3:4].astype(cdt)        # -1 / (2 * sigma^2)

    # Pixel-space offsets in f32 (large-coordinate cancellation), rest in cdt.
    dx = (px - mx).astype(cdt)
    dy = (py - my).astype(cdt)
    d2 = dx * dx + dy * dy                    # (Nb, TILE) cdt
    a = jnp.exp(d2 * nisig + log_opac)        # opacity folded into exponent
    a = jnp.minimum(a, 0.99)
    log_om_a = jnp.log(1.0 - a)               # (Nb, TILE) cdt

    # Exclusive in-block prefix sum of log(1-a) via strictly-lower-triangular
    # bf16 matmul with f32 accumulation.
    cum = jnp.dot(ltri_ref[...], log_om_a.astype(jnp.bfloat16),
                  preferred_element_type=jnp.float32)       # (Nb, TILE) f32
    trans = jnp.exp((cum + logt_ref[...]).astype(cdt))       # (Nb, TILE) cdt
    wgt = (a * trans).astype(jnp.bfloat16)                   # (Nb, TILE)

    # Fused color/depth/alpha reduction into the resident (8, TILE) output.
    out_ref[...] += jnp.dot(om_ref[...], wgt,
                            preferred_element_type=jnp.float32)

    # Carry log-transmittance across gaussian blocks: reuse the last row of
    # the exclusive prefix + the last log term (no cross-sublane reduction).
    last = cum.shape[0] - 1
    logt_ref[...] = (logt_ref[...] + cum[last:last + 1, :]
                     + log_om_a[last:last + 1, :].astype(jnp.float32))


def _rasterize_pallas(pix_xy, gparams, outmat, ltri, n_pix_padded, tile_p, nb):
    n_g = gparams.shape[0]
    grid = (n_pix_padded // tile_p, n_g // nb)

    kernel = functools.partial(_raster_kernel, cdt=_ELEM_DTYPE)

    return pl.pallas_call(
        kernel,
        out_shape=jax.ShapeDtypeStruct((8, n_pix_padded), jnp.float32),
        grid_spec=pltpu.PrefetchScalarGridSpec(
            num_scalar_prefetch=0,
            grid=grid,
            in_specs=[
                pl.BlockSpec((2, tile_p), lambda j, b: (0, j)),   # pixel xy (f32)
                pl.BlockSpec((nb, 4), lambda j, b: (b, 0)),       # gaussians (f32)
                pl.BlockSpec((8, nb), lambda j, b: (0, b)),       # fused out mat (bf16)
                pl.BlockSpec((nb, nb), lambda j, b: (0, 0)),      # ltri (bf16, invariant)
            ],
            out_specs=pl.BlockSpec((8, tile_p), lambda j, b: (0, j)),
            scratch_shapes=[
                pltpu.VMEM((1, tile_p), jnp.float32),   # carried log-transmittance
            ],
        ),
        compiler_params=pltpu.CompilerParams(
            dimension_semantics=("parallel", "arbitrary"),
            vmem_limit_bytes=16 * 1024 * 1024,
        ),
    )(pix_xy, gparams, outmat, ltri)


# ----------------------------------------------------------------------------
# JAX glue: projection, depth sort, padding, output reshape.
# ----------------------------------------------------------------------------
class OctreeGaussianRasterizationSettings(NamedTuple):
    image_height: int
    image_width: int
    tanfovx: float
    tanfovy: float
    bg: jnp.ndarray           # (3,)
    scale_modifier: float
    viewmatrix: jnp.ndarray   # (4,4), row-vector convention: p' = p @ M
    projmatrix: jnp.ndarray   # (4,4)
    sh_degree: int
    campos: jnp.ndarray       # (3,)
    debug: bool = False


def rasterize_octree_gaussian(positions, colors_precomp, opacities, depths,
                              aabb, raster_settings):
    s = raster_settings
    h, w = int(s.image_height), int(s.image_width)
    n = positions.shape[0]
    f32 = jnp.float32

    positions = positions.astype(f32)
    colors_precomp = colors_precomp.astype(f32)
    opacities = opacities.astype(f32).reshape(n, 1)
    depths = depths.astype(f32).reshape(n)

    # --- project centers to pixel coordinates (glue; tiny) -------------------
    hom = jnp.concatenate([positions, jnp.ones((n, 1), f32)], axis=1)
    p_proj = hom @ s.projmatrix.astype(f32)
    p_w = p_proj[:, 3:4]
    p_w = jnp.where(jnp.abs(p_w) < 1e-6,
                    jnp.where(p_w < 0.0, -1e-6, 1e-6), p_w)
    ndc = p_proj[:, :2] / p_w
    px = ((ndc[:, 0] + 1.0) * w - 1.0) * 0.5
    py = ((ndc[:, 1] + 1.0) * h - 1.0) * 0.5

    # cull gaussians behind the near plane (opacity -> 0)
    valid = depths > 0.2
    opac = jnp.where(valid[:, None], opacities, 0.0)

    # --- depth sort (front to back) -------------------------------------------
    order = jnp.argsort(depths)
    px, py = px[order], py[order]
    cols = colors_precomp[order]
    opac = opac[order]
    d_sorted = depths[order]

    # per-gaussian screen-space footprint from voxel size / perspective
    focal_x = w / (2.0 * float(s.tanfovx))
    voxel_size = aabb.astype(f32)[3] / 16.0
    sigma = float(s.scale_modifier) * focal_x * voxel_size / jnp.maximum(
        d_sorted, 0.2)
    sigma = jnp.maximum(sigma, 0.5)
    nisig = (-1.0 / (2.0 * sigma * sigma)).reshape(n, 1)        # folded negate
    log_opac = jnp.log(jnp.maximum(opac, 1e-12))                # finite log(0)
    log_opac = jnp.maximum(log_opac, _LOG_EPS)

    # --- pad gaussian count to a multiple of the MXU block --------------------
    nb = _NB
    n_g = _round_up(max(n, 1), nb)
    n_pad = n_g - n

    # consolidated per-gaussian params: (N_g, 4) = [mx, my, log_opac, nisig]
    gparams = jnp.concatenate(
        [px.reshape(n, 1), py.reshape(n, 1), log_opac, nisig], axis=1)
    gparams = jnp.pad(gparams, ((0, n_pad), (0, 0)))
    if n_pad:
        # padded rows: log_opac very negative -> zero contribution; nisig benign
        gparams = gparams.at[n:, 2].set(_LOG_EPS)
        gparams = gparams.at[n:, 3].set(-1.0)

    # fused output matrix (8, N_g): rows 0-2 colors^T, 3 depth, 4 ones, 5-7 pad
    ones_row = jnp.ones((1, n), f32)
    outmat = jnp.concatenate(
        [cols.T, d_sorted.reshape(1, n), ones_row, jnp.zeros((3, n), f32)],
        axis=0)
    outmat = jnp.pad(outmat, ((0, 0), (0, n_pad))).astype(jnp.bfloat16)

    # strictly-lower-triangular mask (exact 0/1 in bf16, grid-invariant input)
    ltri = jnp.tril(jnp.ones((nb, nb), f32), k=-1).astype(jnp.bfloat16)

    # --- pixel tiling ----------------------------------------------------------
    n_pix = h * w
    tile_p = min(_MAX_TILE_P, _round_up(n_pix, 128))
    # v7x megacore: give the "parallel" pixel axis >= 2 iterations when possible
    if _round_up(n_pix, tile_p) // tile_p < 2 and tile_p >= 512:
        tile_p //= 2
    n_pix_padded = _round_up(n_pix, tile_p)

    # exact pixel-center coordinates computed with int32 arithmetic in glue
    idx = jnp.arange(n_pix_padded, dtype=jnp.int32)
    py_i = idx // w
    px_i = idx - py_i * w
    pix_xy = jnp.stack(
        [px_i.astype(f32) + 0.5, py_i.astype(f32) + 0.5], axis=0)  # (2, P)

    fused = _rasterize_pallas(pix_xy, gparams, outmat, ltri,
                              n_pix_padded, tile_p, nb)            # (8, P) f32

    # background blend + row splitting in glue (tiny elementwise over image)
    alpha_flat = fused[4:5, :n_pix]
    bg_col = s.bg.astype(f32).reshape(3, 1)
    color_flat = fused[0:3, :n_pix] + bg_col * (1.0 - alpha_flat)
    depth_flat = fused[3:4, :n_pix]

    color = color_flat.reshape(3, h, w)
    depth = depth_flat.reshape(1, h, w)
    alpha = alpha_flat.reshape(1, h, w)
    return color, depth, alpha


class OctreeGaussianRasterizer:
    """JAX/Pallas mirror of the PyTorch OctreeGaussianRasterizer module."""

    def __init__(self, raster_settings):
        self.raster_settings = raster_settings

    def __call__(self, positions, opacities, shs=None, colors_precomp=None,
                 depths=None, aabb=None, aux=None):
        if (shs is None and colors_precomp is None) or (
                shs is not None and colors_precomp is not None):
            raise Exception(
                'Please provide excatly one of either SHs or precomputed colors!')
        if colors_precomp is None:
            # degree-0 SH evaluation (glue); higher degrees not needed here.
            sh_c0 = 0.28209479177387814
            colors_precomp = jnp.clip(sh_c0 * shs[:, 0, :] + 0.5, 0.0, None)
        return rasterize_octree_gaussian(
            positions, colors_precomp, opacities, depths, aabb,
            self.raster_settings)


# ----------------------------------------------------------------------------
# Demo
# ----------------------------------------------------------------------------
if __name__ == "__main__":
    key = jax.random.PRNGKey(0)
    k1, k2, k3 = jax.random.split(key, 3)

    N = 60
    H = W = 16
    tanfov = 0.5

    positions = jax.random.uniform(k1, (N, 3), jnp.float32, -0.8, 0.8)
    opacities = jax.random.uniform(k2, (N, 1), jnp.float32, 0.3, 0.9)
    colors = jax.random.uniform(k3, (N, 3), jnp.float32, 0.0, 1.0)
    aabb = jnp.array([-1.0, -1.0, -1.0, 2.0, 2.0, 2.0], jnp.float32)

    # Camera at (0,0,-4) looking down +z; row-vector convention p' = p @ M.
    viewmatrix = jnp.array([[1., 0., 0., 0.],
                            [0., 1., 0., 0.],
                            [0., 0., 1., 0.],
                            [0., 0., 4., 1.]], jnp.float32)
    persp = jnp.array([[1.0 / tanfov, 0.0, 0.0, 0.0],
                       [0.0, 1.0 / tanfov, 0.0, 0.0],
                       [0.0, 0.0, 1.0, 1.0],
                       [0.0, 0.0, 0.0, 0.0]], jnp.float32)
    projmatrix = viewmatrix @ persp

    # View-space depths (what the caller normally precomputes and passes in).
    hom = jnp.concatenate([positions, jnp.ones((N, 1), jnp.float32)], axis=1)
    depths = (hom @ viewmatrix)[:, 2]

    settings = OctreeGaussianRasterizationSettings(
        image_height=H, image_width=W,
        tanfovx=tanfov, tanfovy=tanfov,
        bg=jnp.array([0.2, 0.3, 0.4], jnp.float32),
        scale_modifier=1.0,
        viewmatrix=viewmatrix, projmatrix=projmatrix,
        sh_degree=0,
        campos=jnp.array([0.0, 0.0, -4.0], jnp.float32),
        debug=False)

    rasterizer = OctreeGaussianRasterizer(settings)
    color, depth, alpha = rasterizer(
        positions, opacities, colors_precomp=colors, depths=depths, aabb=aabb)

    jax.block_until_ready((color, depth, alpha))

    assert color.shape == (3, H, W)
    assert depth.shape == (1, H, W)
    assert alpha.shape == (1, H, W)
    assert bool(jnp.all(jnp.isfinite(color)))
    assert bool(jnp.all(jnp.isfinite(depth)))
    # bf16 compositing path allows ~0.5% numerical slack on the alpha sum.
    assert bool(jnp.all((alpha >= 0.0) & (alpha <= 1.0 + 1e-2)))
    print("KERNEL_OK")
</pallas_src>

<mosaic_0001>
module attributes {stable_mosaic.version = 11 : i64} {
  func.func @_raster_kernel(%arg0: i32, %arg1: i32, %arg2: memref<2x256xf32, #tpu.memory_space<vmem>>, %arg3: memref<256x4xf32, #tpu.memory_space<vmem>>, %arg4: memref<8x256xbf16, #tpu.memory_space<vmem>>, %arg5: memref<256x256xbf16, #tpu.memory_space<vmem>>, %arg6: memref<8x256xf32, #tpu.memory_space<vmem>>, %arg7: memref<1x256xf32, #tpu.memory_space<vmem>>) attributes {dimension_semantics = [#tpu.dimension_semantics<parallel>, #tpu.dimension_semantics<arbitrary>], iteration_bounds = array<i64: 1, 1>, scalar_prefetch = 0 : i64, scratch_operands = 1 : i64, tpu.core_type = #tpu.core_type<tc>, window_params = [{transform_indices = @transform_0, window_bounds = array<i64: 2, 256>}, {transform_indices = @transform_1, window_bounds = array<i64: 256, 4>}, {transform_indices = @transform_2, window_bounds = array<i64: 8, 256>}, {pipeline_mode = #tpu.pipeline_mode<synchronous>, transform_indices = @transform_3, window_bounds = array<i64: 256, 256>}, {transform_indices = @transform_4, window_bounds = array<i64: 8, 256>}]} {
    %c0_i32 = arith.constant 0 : i32
    %0 = arith.cmpi eq, %arg1, %c0_i32 : i32
    %1 = arith.extui %0 : i1 to i32
    %c0_i32_0 = arith.constant 0 : i32
    %2 = arith.cmpi ne, %1, %c0_i32_0 : i32
    scf.if %2 {
      %cst_26 = arith.constant 0.000000e+00 : f32
      %52 = vector.broadcast %cst_26 : f32 to vector<8x256xf32>
      %c0_27 = arith.constant 0 : index
      %c0_28 = arith.constant 0 : index
      %53 = vector.load %arg6[%c0_27, %c0_28] : memref<8x256xf32, #tpu.memory_space<vmem>>, vector<8x256xf32>
      tpu.vector_store %arg6[%c0_27, %c0_28], %52 {strides = array<i32>} : memref<8x256xf32, #tpu.memory_space<vmem>>, vector<8x256xf32>,
      %cst_29 = arith.constant 0.000000e+00 : f32
      %54 = vector.broadcast %cst_29 : f32 to vector<1x256xf32>
      %c0_30 = arith.constant 0 : index
      %c0_31 = arith.constant 0 : index
      %55 = vector.load %arg7[%c0_30, %c0_31] : memref<1x256xf32, #tpu.memory_space<vmem>>, vector<1x256xf32>
      tpu.vector_store %arg7[%c0_30, %c0_31], %54 {strides = array<i32>} : memref<1x256xf32, #tpu.memory_space<vmem>>, vector<1x256xf32>,
    } else {
    }
    %c0 = arith.constant 0 : index
    %c0_1 = arith.constant 0 : index
    %3 = vector.load %arg2[%c0, %c0_1] : memref<2x256xf32, #tpu.memory_space<vmem>>, vector<1x256xf32>
    %c1 = arith.constant 1 : index
    %c0_2 = arith.constant 0 : index
    %4 = vector.load %arg2[%c1, %c0_2] : memref<2x256xf32, #tpu.memory_space<vmem>>, vector<1x256xf32>
    %c0_3 = arith.constant 0 : index
    %c0_4 = arith.constant 0 : index
    %5 = vector.load %arg3[%c0_3, %c0_4] : memref<256x4xf32, #tpu.memory_space<vmem>>, vector<256x1xf32>
    %c0_5 = arith.constant 0 : index
    %c1_6 = arith.constant 1 : index
    %6 = vector.load %arg3[%c0_5, %c1_6] : memref<256x4xf32, #tpu.memory_space<vmem>>, vector<256x1xf32>
    %c0_7 = arith.constant 0 : index
    %c2 = arith.constant 2 : index
    %7 = vector.load %arg3[%c0_7, %c2] : memref<256x4xf32, #tpu.memory_space<vmem>>, vector<256x1xf32>
    %8 = arith.truncf %7 : vector<256x1xf32> to vector<256x1xbf16>
    %c0_8 = arith.constant 0 : index
    %c3 = arith.constant 3 : index
    %9 = vector.load %arg3[%c0_8, %c3] : memref<256x4xf32, #tpu.memory_space<vmem>>, vector<256x1xf32>
    %10 = arith.truncf %9 : vector<256x1xf32> to vector<256x1xbf16>
    %11 = vector.broadcast %3 : vector<1x256xf32> to vector<256x256xf32>
    %12 = vector.broadcast %5 : vector<256x1xf32> to vector<256x256xf32>
    %13 = arith.subf %11, %12 : vector<256x256xf32>
    %14 = arith.truncf %13 : vector<256x256xf32> to vector<256x256xbf16>
    %15 = vector.broadcast %4 : vector<1x256xf32> to vector<256x256xf32>
    %16 = vector.broadcast %6 : vector<256x1xf32> to vector<256x256xf32>
    %17 = arith.subf %15, %16 : vector<256x256xf32>
    %18 = arith.truncf %17 : vector<256x256xf32> to vector<256x256xbf16>
    %19 = arith.mulf %14, %14 : vector<256x256xbf16>
    %20 = arith.mulf %18, %18 : vector<256x256xbf16>
    %21 = arith.addf %19, %20 : vector<256x256xbf16>
    %22 = vector.broadcast %10 : vector<256x1xbf16> to vector<256x256xbf16>
    %23 = arith.mulf %21, %22 : vector<256x256xbf16>
    %24 = vector.broadcast %8 : vector<256x1xbf16> to vector<256x256xbf16>
    %25 = arith.addf %23, %24 : vector<256x256xbf16>
    %26 = math.exp %25 : vector<256x256xbf16>
    %cst = arith.constant 9.882810e-01 : bf16
    %27 = vector.broadcast %cst : bf16 to vector<256x256xbf16>
    %28 = arith.minimumf %26, %27 : vector<256x256xbf16>
    %cst_9 = arith.constant 1.000000e+00 : bf16
    %29 = vector.broadcast %cst_9 : bf16 to vector<256x256xbf16>
    %30 = arith.subf %29, %28 : vector<256x256xbf16>
    %31 = math.log %30 : vector<256x256xbf16>
    %c0_10 = arith.constant 0 : index
    %c0_11 = arith.constant 0 : index
    %32 = vector.load %arg5[%c0_10, %c0_11] : memref<256x256xbf16, #tpu.memory_space<vmem>>, vector<256x256xbf16>
    %cst_12 = arith.constant dense<0.000000e+00> : vector<256x256xf32>
    %33 = tpu.matmul %32, %31, %cst_12 {dimension_numbers = #tpu.dot_dimension_numbers<[1], [0], [0], [1], [0, 0, 1, 1], [], []>} : vector<256x256xbf16>, vector<256x256xbf16>, vector<256x256xf32> -> vector<256x256xf32>
    %c0_13 = arith.constant 0 : index
    %c0_14 = arith.constant 0 : index
    %34 = vector.load %arg7[%c0_13, %c0_14] : memref<1x256xf32, #tpu.memory_space<vmem>>, vector<1x256xf32>
    %35 = vector.broadcast %34 : vector<1x256xf32> to vector<256x256xf32>
    %36 = arith.addf %33, %35 : vector<256x256xf32>
    %37 = arith.truncf %36 : vector<256x256xf32> to vector<256x256xbf16>
    %38 = math.exp %37 : vector<256x256xbf16>
    %39 = arith.mulf %28, %38 : vector<256x256xbf16>
    %c0_15 = arith.constant 0 : index
    %c0_16 = arith.constant 0 : index
    %40 = vector.load %arg6[%c0_15, %c0_16] : memref<8x256xf32, #tpu.memory_space<vmem>>, vector<8x256xf32>
    %c0_17 = arith.constant 0 : index
    %c0_18 = arith.constant 0 : index
    %41 = vector.load %arg4[%c0_17, %c0_18] : memref<8x256xbf16, #tpu.memory_space<vmem>>, vector<8x256xbf16>
    %cst_19 = arith.constant dense<0.000000e+00> : vector<8x256xf32>
    %42 = tpu.matmul %41, %39, %cst_19 {dimension_numbers = #tpu.dot_dimension_numbers<[1], [0], [0], [1], [0, 0, 1, 1], [], []>} : vector<8x256xbf16>, vector<256x256xbf16>, vector<8x256xf32> -> vector<8x256xf32>
    %43 = arith.addf %40, %42 : vector<8x256xf32>
    %c0_20 = arith.constant 0 : index
    %c0_21 = arith.constant 0 : index
    %44 = vector.load %arg6[%c0_20, %c0_21] : memref<8x256xf32, #tpu.memory_space<vmem>>, vector<8x256xf32>
    tpu.vector_store %arg6[%c0_20, %c0_21], %43 {strides = array<i32>} : memref<8x256xf32, #tpu.memory_space<vmem>>, vector<8x256xf32>,
    %c0_22 = arith.constant 0 : index
    %c0_23 = arith.constant 0 : index
    %45 = vector.load %arg7[%c0_22, %c0_23] : memref<1x256xf32, #tpu.memory_space<vmem>>, vector<1x256xf32>
    %46 = vector.extract_strided_slice %33 {offsets = [255, 0], sizes = [1, 256], strides = [1, 1]} : vector<256x256xf32> to vector<1x256xf32>
    %47 = arith.addf %45, %46 : vector<1x256xf32>
    %48 = vector.extract_strided_slice %31 {offsets = [255, 0], sizes = [1, 256], strides = [1, 1]} : vector<256x256xbf16> to vector<1x256xbf16>
    %49 = arith.extf %48 : vector<1x256xbf16> to vector<1x256xf32>
    %50 = arith.addf %47, %49 : vector<1x256xf32>
    %c0_24 = arith.constant 0 : index
    %c0_25 = arith.constant 0 : index
    %51 = vector.load %arg7[%c0_24, %c0_25] : memref<1x256xf32, #tpu.memory_space<vmem>>, vector<1x256xf32>
    tpu.vector_store %arg7[%c0_24, %c0_25], %50 {strides = array<i32>} : memref<1x256xf32, #tpu.memory_space<vmem>>, vector<1x256xf32>,
    return
  }
  func.func @transform_0(%arg0: i32, %arg1: i32) -> (i32, i32) {
    %c0_i32 = arith.constant 0 : i32
    %c0_i32_0 = arith.constant 0 : i32
    return %c0_i32, %arg0 : i32, i32
  }
  func.func @transform_1(%arg0: i32, %arg1: i32) -> (i32, i32) {
    %c0_i32 = arith.constant 0 : i32
    %c0_i32_0 = arith.constant 0 : i32
    return %arg1, %c0_i32 : i32, i32
  }
  func.func @transform_2(%arg0: i32, %arg1: i32) -> (i32, i32) {
    %c0_i32 = arith.constant 0 : i32
    %c0_i32_0 = arith.constant 0 : i32
    return %c0_i32, %arg1 : i32, i32
  }
  func.func @transform_3(%arg0: i32, %arg1: i32) -> (i32, i32) {
    %c0_i32 = arith.constant 0 : i32
    %c0_i32_0 = arith.constant 0 : i32
    %c0_i32_1 = arith.constant 0 : i32
    return %c0_i32, %c0_i32_0 : i32, i32
  }
  func.func @transform_4(%arg0: i32, %arg1: i32) -> (i32, i32) {
    %c0_i32 = arith.constant 0 : i32
    %c0_i32_0 = arith.constant 0 : i32
    return %c0_i32, %arg0 : i32, i32
  }
}

</mosaic_0001>

<bundles_post_ra>
// kernel: tpu_custom_call.1
= control target key start
LH: loop header
LB: loop body
LE: loop exit
PB: predicated region body
PF: predicated region fallthrough
CT: control target
= control target key end

     0   :  { %v3313_v2 = vmov 1   ;;  %v3316_v4 = vmov 0   ;;  %s3305_s0 = inlined_call_operand.vmem [shape: f32[2,256], index: 0, kind: input, shape index: {}]   ;;  %s3306_s1 = inlined_call_operand.vmem [shape: f32[256,4], index: 1, kind: input, shape index: {}]   ;;  %s3307_s2 = inlined_call_operand.vmem [shape: bf16[8,256], index: 2, kind: input, shape index: {}]   ;;  %s3308_s3 = inlined_call_operand.vmem [shape: bf16[256,256], index: 3, kind: input, shape index: {}]   ;;  %s3309_s4 = inlined_call_operand.hbm [shape: f32[8,256], index: 4, kind: output, shape index: {}]  }
   0x1   :  { %v36_v0 = vld [vmem:[%s3306_s1 + $0x10] sm:$0xff]  ;;  %v34_v1 = vld [vmem:[%s3306_s1] sm:$0xff]  ;;  %1935 = vset.pattern.permute.xlu0 %v3313_v2  ;;  %1933 = vset.pattern.permute.xlu1 %v3313_v2  ;;  %v35_v3 = vld [vmem:[%s3306_s1 + $0x8] sm:$0xff] }
   0x2   :  { %369 = vperm.xlu0 %1935, %v36_v0   ;;  %361 = vperm.xlu1 %1933, %v34_v1   ;;  %v37_v5 = vld [vmem:[%s3306_s1 + $0x18] sm:$0xff]  ;;  %v39_v6 = vld [vmem:[%s3306_s1 + $0x28] sm:$0xff]  ;;  %v38_v7 = vld [vmem:[%s3306_s1 + $0x20] sm:$0xff] }
   0x3   :  { %v2310_v8 = vld [vmem:[%s3306_s1 + $0x38] sm:$0xff] }
   0x6   :  { %1936 = vset.pattern.permute.xlu0 %v3316_v4  ;;  %365 = vperm.xlu1 %1933, %v35_v3  }
   0x7   :  { %95 = vperm.xlu0 %1936, %v34_v1  }
   0xa   :  { %1934 = vset.pattern.permute.xlu1 %v3316_v4 }
   0xb   :  { %100 = vperm.xlu0 %1936, %v35_v3   ;;  %110 = vperm.xlu1 %1934, %v37_v5  }
   0xf   :  { %105 = vperm.xlu0 %1936, %v36_v0   ;;  %1937 = vset.pattern.permute.xlu1 %v3313_v2 }
  0x10   :  { %373 = vperm.xlu1 %1937, %v37_v5  }
  0x13   :  { %120 = vperm.xlu0 %1936, %v39_v6  }
  0x14   :  { %1938 = vset.pattern.permute.xlu1 %v3316_v4 }
  0x15   :  { %9 = vsyncpa [#allocation4], 0  ;;  %115 = vperm.xlu1 %1938, %v38_v7   ;;  %v43_v9 = vld [vmem:[%s3306_s1 + $0x48] sm:$0xff]  ;;  %v45_v10 = vld [vmem:[%s3306_s1 + $0x58] sm:$0xff]  ;;  %v66_v11 = vpack.c.bf16 %v35_v3, %v34_v1  ;;  %v3311_v13 = vmov 2   ;;  %v67_v19 = vpack.c.bf16 %v37_v5, %v36_v0  ;;  %v68_v26 = vpack.c.bf16 %v39_v6, %v38_v7 }
  0x16   :  { %v2323_v12 = vld [vmem:[%s3306_s1 + $0x68] sm:$0xff]  ;;  %v2330_v14 = vld [vmem:[%s3306_s1 + $0x78] sm:$0xff]  ;;  %v40_v15 = vld [vmem:[%s3306_s1 + $0x30] sm:$0xff]  ;;  %v3310_v27 = vmov 3   ;;  %v26_v42 = vlaneseq  ;;  %v3329_v45 = vmov 0  ;;  %v2254_v46 = vmov 0.0  }
  0x17   :  { %130 = vperm.xlu0 %1936, %v2310_v8   ;;  %v2340_v16 = vld [vmem:[%s3306_s1 + $0x88] sm:$0xff]  ;;  %v2347_v17 = vld [vmem:[%s3306_s1 + $0x98] sm:$0xff]  ;;  %v42_v22 = vld [vmem:[%s3306_s1 + $0x40] sm:$0xff]  ;;  %v69_v29 = vpack.c.bf16 %v2310_v8, %v40_v15 }
  0x18   :  { %v2353_v18 = vld [vmem:[%s3306_s1 + $0xa8] sm:$0xff]  ;;  %v2360_v20 = vld [vmem:[%s3306_s1 + $0xb8] sm:$0xff]  ;;  %v44_v28 = vld [vmem:[%s3306_s1 + $0x50] sm:$0xff]  ;;  %v70_v30 = vpack.c.bf16 %v43_v9, %v42_v22  ;;  %vm2452_vm0 = vcmp.lt.s32.totalorder %v26_v42, 256 }
  0x19   :  { %1939 = vset.pattern.permute.xlu1 %v3313_v2  ;;  %v2367_v21 = vld [vmem:[%s3306_s1 + $0xc8] sm:$0xff]  ;;  %v2377_v23 = vld [vmem:[%s3306_s1 + $0xd8] sm:$0xff]  ;;  %v71_v31 = vpack.c.bf16 %v45_v10, %v44_v28  ;;  %v46_v32 = vld [vmem:[%s3306_s1 + $0x60] sm:$0xff]  ;;  %v3330_v45 = vsel %vm2452_vm0, 4294967295, %v3329_v45  ;;  %30 = vst.msk [vmem:[#allocation2] sm:$0x3] %vm2452_vm0, %v2254_v46 }
  0x1a   :  { %377 = vperm.xlu1 %1939, %v38_v7   ;;  %v2384_v24 = vld [vmem:[%s3306_s1 + $0xe8] sm:$0xff]  ;;  %v2390_v25 = vld [vmem:[%s3306_s1 + $0xf8] sm:$0xff]  ;;  %v72_v33 = vpack.c.bf16 %v2323_v12, %v46_v32  ;;  %v48_v34 = vld [vmem:[%s3306_s1 + $0x70] sm:$0xff]  ;;  %3331 = vst [vmem:[#allocation6_spill] sm:$0xff] %v3330_v45 }
  0x1b   :  { %140 = vperm.xlu0 %1936, %v43_v9   ;;  %v2411_v35 = vpack.c.bf16 %v2330_v14, %v48_v34  ;;  %v50_v36 = vld [vmem:[%s3306_s1 + $0x80] sm:$0xff]  ;;  %v52_v38 = vld [vmem:[%s3306_s1 + $0x90] sm:$0xff] }
  0x1c   :  { %v2419_v37 = vpack.c.bf16 %v2340_v16, %v50_v36  ;;  %v2427_v39 = vpack.c.bf16 %v2347_v17, %v52_v38  ;;  %v2433_v40 = vld [vmem:[%s3306_s1 + $0xa0] sm:$0xff]  ;;  %v2444_v43 = vld [vmem:[%s3306_s1 + $0xb0] sm:$0xff] }
  0x1d   :  { %v2438_v41 = vpack.c.bf16 %v2353_v18, %v2433_v40  ;;  %v2449_v44 = vpack.c.bf16 %v2360_v20, %v2444_v43  ;;  %v2461_v47 = vld [vmem:[%s3306_s1 + $0xc0] sm:$0xff]  ;;  %v2472_v49 = vld [vmem:[%s3306_s1 + $0xd0] sm:$0xff] }
  0x1e   :  { %381 = vperm.xlu1 %1939, %v39_v6   ;;  %v2467_v48 = vpack.c.bf16 %v2367_v21, %v2461_v47  ;;  %v2477_v50 = vpack.c.bf16 %v2377_v23, %v2472_v49  ;;  %v2489_v53 = vld [vmem:[%s3306_s1 + $0xe0] sm:$0xff] }
  0x1f   :  { %150 = vperm.xlu0 %1936, %v45_v10   ;;  %v2493_v54 = vpack.c.bf16 %v2384_v24, %v2489_v53 }
  0x22   :  { %1940 = vset.pattern.permute.xlu1 %v3311_v13 }
  0x23   :  { %160 = vperm.xlu0 %1936, %v2323_v12   ;;  %793 = vperm.xlu1 %1940, %v66_v11  }
  0x27   :  { %170 = vperm.xlu0 %1936, %v2330_v14   ;;  %1941 = vset.pattern.permute.xlu1 %v3316_v4 }
  0x28   :  { %125 = vperm.xlu1 %1941, %v40_v15  }
  0x2b   :  { %180 = vperm.xlu0 %1936, %v2340_v16  }
  0x2c   :  { %1942 = vset.pattern.permute.xlu1 %v3313_v2 }
  0x2d   :  { %385 = vperm.xlu1 %1942, %v40_v15   ;;  %v2551_v15 = vshrl.u32 %v26_v42, 7 }
  0x2f   :  { %190 = vperm.xlu0 %1936, %v2347_v17   ;;  %3334 = vst [vmem:[#allocation9_spill] sm:$0xff] %v2551_v15 }
  0x31   :  { %389 = vperm.xlu1 %1942, %v2310_v8  }
  0x33   :  { %200 = vperm.xlu0 %1936, %v2353_v18  }
  0x35   :  { %1943 = vset.pattern.permute.xlu1 %v3311_v13 }
  0x36   :  { %797 = vperm.xlu1 %1943, %v67_v19  }
  0x37   :  { %210 = vperm.xlu0 %1936, %v2360_v20  }
  0x3a   :  { %1944 = vset.pattern.permute.xlu1 %v3316_v4 }
  0x3b   :  { %220 = vperm.xlu0 %1936, %v2367_v21   ;;  %135 = vperm.xlu1 %1944, %v42_v22  }
  0x3f   :  { %230 = vperm.xlu0 %1936, %v2377_v23   ;;  %1945 = vset.pattern.permute.xlu1 %v3313_v2 }
  0x40   :  { %393 = vperm.xlu1 %1945, %v42_v22   ;;  %v31_v22 = vld [vmem:[%s3305_s0] ss:$2 sm:$0x3] }
  0x43   :  { %240 = vperm.xlu0 %1936, %v2384_v24  }
  0x44   :  { %397 = vperm.xlu1 %1945, %v43_v9  }
  0x47   :  { %250 = vperm.xlu0 %1936, %v2390_v25  }
  0x48   :  { %1946 = vset.pattern.permute.xlu1 %v3311_v13 }
  0x49   :  { %801 = vperm.xlu1 %1946, %v68_v26  }
  0x4b   :  { %1978 = vset.pattern.permute.xlu0 %v3310_v27 }
  0x4c   :  { %682 = vperm.xlu0 %1978, %v66_v11  }
  0x4d   :  { %1947 = vset.pattern.permute.xlu1 %v3316_v4 }
  0x4e   :  { %145 = vperm.xlu1 %1947, %v44_v28  }
  0x50   :  { %687 = vperm.xlu0 %1978, %v67_v19   ;;  %v2561_v19 = vsub.s32 1, %v2551_v15 }
  0x52   :  { %1948 = vset.pattern.permute.xlu1 %v3313_v2  ;;  %3337 = vst [vmem:[#allocation12_spill] sm:$0xff] %v2561_v19 }
  0x53   :  { %401 = vperm.xlu1 %1948, %v44_v28   ;;  %v1890_v28 = vld [vmem:[%s3305_s0 + $0x1] ss:$2 sm:$0x3] }
  0x54   :  { %692 = vperm.xlu0 %1978, %v68_v26  }
  0x57   :  { %405 = vperm.xlu1 %1948, %v45_v10  }
  0x58   :  { %697 = vperm.xlu0 %1978, %v69_v29  }
  0x5b   :  { %1949 = vset.pattern.permute.xlu1 %v3311_v13 }
  0x5c   :  { %702 = vperm.xlu0 %1978, %v70_v30   ;;  %805 = vperm.xlu1 %1949, %v69_v29  }
  0x60   :  { %707 = vperm.xlu0 %1978, %v71_v31   ;;  %1950 = vset.pattern.permute.xlu1 %v3316_v4 }
  0x61   :  { %155 = vperm.xlu1 %1950, %v46_v32  }
  0x64   :  { %712 = vperm.xlu0 %1978, %v72_v33  }
  0x65   :  { %1951 = vset.pattern.permute.xlu1 %v3313_v2 }
  0x66   :  { %409 = vperm.xlu1 %1951, %v46_v32  }
  0x68   :  { %717 = vperm.xlu0 %1978, %v2411_v35  }
  0x6a   :  { %413 = vperm.xlu1 %1951, %v2323_v12  }
  0x6c   :  { %722 = vperm.xlu0 %1978, %v2419_v37  }
  0x6e   :  { %1952 = vset.pattern.permute.xlu1 %v3311_v13 }
  0x6f   :  { %809 = vperm.xlu1 %1952, %v70_v30  }
  0x70   :  { %727 = vperm.xlu0 %1978, %v2427_v39  }
  0x73   :  { %1953 = vset.pattern.permute.xlu1 %v3316_v4 }
  0x74   :  { %165 = vperm.xlu1 %1953, %v48_v34   ;;  %732 = vperm.xlu0 %1978, %v2438_v41  }
  0x78   :  { %1954 = vset.pattern.permute.xlu1 %v3313_v2  ;;  %737 = vperm.xlu0 %1978, %v2449_v44  }
  0x79   :  { %417 = vperm.xlu1 %1954, %v48_v34  }
  0x7c   :  { %742 = vperm.xlu0 %1978, %v2467_v48  }
  0x7d   :  { %421 = vperm.xlu1 %1954, %v2330_v14  }
  0x80   :  { %747 = vperm.xlu0 %1978, %v2477_v50  }
  0x81   :  { %v2481_v51 = vpop.permute.xlu1 %361  ;;  %1955 = vset.pattern.permute.xlu1 %v3311_v13  ;;  %v2484_v52 = vpop.permute.xlu0 %369 }
  0x82   :  { %813 = vperm.xlu1 %1955, %v71_v31   ;;  %v2578_v31 = vrot.slane %v31_v22, %v2561_v19 }
  0x84   :  { %1982 = vset.pattern.permute.xlu0 %v3311_v13 }
  0x85   :  { %v2496_v55 = vpop.permute.xlu1 %365  ;;  %849 = vperm.xlu0 %1982, %v2493_v54  }
  0x86   :  { %v2499_v56 = vpop.permute.xlu0 %95  ;;  %1956 = vset.pattern.permute.xlu1 %v3316_v4 }
  0x87   :  { %175 = vperm.xlu1 %1956, %v50_v36  }
  0x8a   :  { %v2502_v57 = vpop.permute.xlu0 %100  ;;  %v2504_v58 = vpop.permute.xlu1 %110 }
  0x8b   :  { %1957 = vset.pattern.permute.xlu1 %v3313_v2  ;;  %v256_v46 = vsub.f32 %v2578_v31, %v2502_v57 }
  0x8c   :  { %425 = vperm.xlu1 %1957, %v50_v36  }
  0x8e   :  { %v2507_v59 = vpop.permute.xlu0 %105 }
  0x8f   :  { %v2509_v60 = vpop.permute.xlu1 %373  ;;  %v258_v45 = vsub.f32 %v2578_v31, %v2507_v59 }
  0x90   :  { %429 = vperm.xlu1 %1957, %v2340_v16  }
  0x92   :  { %v2512_v61 = vpop.permute.xlu0 %120 }
  0x94   :  { %v2514_v62 = vpop.permute.xlu1 %115  ;;  %1958 = vset.pattern.permute.xlu1 %v3311_v13 }
  0x95   :  { %817 = vperm.xlu1 %1958, %v72_v33   ;;  %v2584_v33 = vrot.slane %v1890_v28, %v2561_v19 }
  0x96   :  { %v2517_v63 = vpop.permute.xlu0 %130 }
  0x97   :  { %v491_v36 = vsub.f32 %v2584_v33, %v2496_v55 }
  0x99   :  { %v2519_v0 = vpop.permute.xlu1 %377  ;;  %1959 = vset.pattern.permute.xlu1 %v3316_v4 }
  0x9a   :  { %185 = vperm.xlu1 %1959, %v52_v38   ;;  %v2522_v1 = vpop.permute.xlu0 %140 }
  0x9d   :  { %v2524_v3 = vpop.permute.xlu1 %381 }
  0x9e   :  { %1960 = vset.pattern.permute.xlu1 %v3313_v2  ;;  %v2527_v5 = vpop.permute.xlu0 %150 }
  0x9f   :  { %433 = vperm.xlu1 %1960, %v52_v38  }
  0xa2   :  { %v2529_v6 = vpop.permute.xlu1 %793  ;;  %v2531_v7 = vpop.permute.xlu0 %160 }
  0xa3   :  { %437 = vperm.xlu1 %1960, %v2347_v17   ;;  %v2558_v17 = vsub.s32 0, %v2551_v15 }
  0xa5   :  { %3336 = vst [vmem:[#allocation11_spill] sm:$0xff] %v2558_v17  ;;  %v2575_v30 = vrot.slane %v31_v22, %v2558_v17  ;;  %v2581_v32 = vrot.slane %v1890_v28, %v2558_v17 }
  0xa6   :  { %v2534_v8 = vpop.permute.xlu0 %170 }
  0xa7   :  { %1961 = vset.pattern.permute.xlu1 %v3311_v13  ;;  %v2537_v9 = vpop.permute.xlu1 %125  ;;  %v253_v38 = vsub.f32 %v2575_v30, %v2499_v56  ;;  %v255_v42 = vsub.f32 %v2575_v30, %v2502_v57  ;;  %v488_v22 = vsub.f32 %v2581_v32, %v2481_v51  ;;  %v257_v57 = vsub.f32 %v2575_v30, %v2507_v59 }
  0xa8   :  { %821 = vperm.xlu1 %1961, %v2411_v35   ;;  %v260_v59 = vsub.f32 %v2578_v31, %v2504_v58 }
  0xaa   :  { %v2540_v10 = vpop.permute.xlu0 %180  ;;  %v320_v17 = vpack.c.bf16 %v260_v59, %v258_v45  ;;  %v261_v45 = vsub.f32 %v2575_v30, %v2514_v62 }
  0xab   :  { %3332 = vst [vmem:[#allocation7_spill] sm:$0xff] %v2540_v10 }
  0xac   :  { %1962 = vset.pattern.permute.xlu1 %v3316_v4  ;;  %v2543_v11 = vpop.permute.xlu1 %385 }
  0xad   :  { %195 = vperm.xlu1 %1962, %v2433_v40  }
  0xae   :  { %v2546_v12 = vpop.permute.xlu0 %190 }
  0xaf   :  { %3333 = vst [vmem:[#allocation8_spill] sm:$0xff] %v2546_v12 }
  0xb0   :  { %v2548_v14 = vpop.permute.xlu1 %389 }
  0xb1   :  { %1963 = vset.pattern.permute.xlu1 %v3313_v2 }
  0xb2   :  { %441 = vperm.xlu1 %1963, %v2433_v40   ;;  %v2555_v16 = vpop.permute.xlu0 %200  ;;  %v254_v40 = vsub.f32 %v2578_v31, %v2499_v56 }
  0xb3   :  { %3335 = vst [vmem:[#allocation10_spill] sm:$0xff] %v2555_v16  ;;  %v502_v16 = vsub.f32 %v2581_v32, %v2548_v14 }
  0xb4   :  { %v318_v2 = vpack.c.bf16 %v256_v46, %v254_v40  ;;  %v259_v40 = vsub.f32 %v2575_v30, %v2504_v58 }
  0xb5   :  { %v2566_v26 = vpop.permute.xlu1 %797 }
  0xb6   :  { %445 = vperm.xlu1 %1963, %v2353_v18   ;;  %v2572_v29 = vpop.permute.xlu0 %210  ;;  %v490_v18 = vsub.f32 %v2581_v32, %v2496_v55  ;;  %v489_v55 = vsub.f32 %v2584_v33, %v2481_v51  ;;  %v492_v51 = vsub.f32 %v2581_v32, %v2484_v52  ;;  %v319_v19 = vpack.c.bf16 %v259_v40, %v257_v57 }
  0xb7   :  { %3338 = vst [vmem:[#allocation13_spill] sm:$0xff] %v2572_v29  ;;  %v587_v40 = vmul.bf16 %v320_v17, %v320_v17  ;;  %v265_v17 = vsub.f32 %v2575_v30, %v2537_v9 }
  0xb8   :  { %v552_v27 = vpack.c.bf16 %v490_v18, %v488_v22  ;;  %v553_v56 = vpack.c.bf16 %v491_v36, %v489_v55  ;;  %v494_v18 = vsub.f32 %v2581_v32, %v2509_v60  ;;  %v495_v36 = vsub.f32 %v2584_v33, %v2509_v60 }
  0xb9   :  { %v585_v22 = vmul.bf16 %v318_v2, %v318_v2  ;;  %v3342_v55 = vmov 1   ;;  %v498_v60 = vsub.f32 %v2581_v32, %v2524_v3  ;;  %v264_v2 = vsub.f32 %v2578_v31, %v2512_v61 }
  0xba   :  { %1964 = vset.pattern.permute.xlu1 %v3311_v13  ;;  %v2587_v34 = vpop.permute.xlu1 %135  ;;  %v2589_v35 = vpop.permute.xlu0 %220  ;;  %v317_v13 = vpack.c.bf16 %v255_v42, %v253_v38  ;;  %v617_v15 = vmul.bf16 %v553_v56, %v553_v56  ;;  %v262_v56 = vsub.f32 %v2578_v31, %v2514_v62  ;;  %v267_v62 = vsub.f32 %v2575_v30, %v2517_v63 }
  0xbb   :  { %3339 = vst [vmem:[#allocation14_spill] sm:$0xff] %v2589_v35  ;;  %825 = vperm.xlu1 %1964, %v2419_v37  }
  0xbc   :  { %v584_v46 = vmul.bf16 %v317_v13, %v317_v13  ;;  %v263_v13 = vsub.f32 %v2575_v30, %v2512_v61  ;;  %v322_v29 = vpack.c.bf16 %v264_v2, %v262_v56 }
  0xbe   :  { %v2608_v28 = vpop.permute.xlu0 %230  ;;  %v321_v35 = vpack.c.bf16 %v263_v13, %v261_v45 }
  0xbf   :  { %3340 = vst [vmem:[#allocation15_spill] sm:$0xff] %v2608_v28  ;;  %1965 = vset.pattern.permute.xlu1 %v3316_v4  ;;  %v2611_v37 = vpop.permute.xlu1 %393  ;;  %v493_v4 = vsub.f32 %v2584_v33, %v2484_v52  ;;  %v616_v52 = vmul.bf16 %v552_v27, %v552_v27  ;;  %v554_v28 = vpack.c.bf16 %v494_v18, %v492_v51 }
  0xc0   :  { %205 = vperm.xlu1 %1965, %v2444_v43   ;;  %v649_v18 = vadd.bf16 %v617_v15, %v585_v22 }
  0xc1   :  { %v555_v58 = vpack.c.bf16 %v495_v36, %v493_v4  ;;  %v497_v4 = vsub.f32 %v2584_v33, %v2519_v0  ;;  %v648_v61 = vadd.bf16 %v616_v52, %v584_v46  ;;  %v586_v36 = vmul.bf16 %v319_v19, %v319_v19 }
  0xc2   :  { %v2626_v38 = vpop.permute.xlu0 %240  ;;  %v618_v59 = vmul.bf16 %v554_v28, %v554_v28  ;;  %v500_v28 = vsub.f32 %v2581_v32, %v2543_v11  ;;  %v3344_v46 = vmov 2  }
  0xc3   :  { %3341 = vst [vmem:[#allocation16_spill] sm:$0xff] %v2626_v38  ;;  %v2632_v42 = vpop.permute.xlu1 %397  ;;  %v499_v38 = vsub.f32 %v2584_v33, %v2524_v3  ;;  %v496_v3 = vsub.f32 %v2581_v32, %v2519_v0 }
  0xc4   :  { %1966 = vset.pattern.permute.xlu1 %v3342_v55  ;;  %v558_v2 = vpack.c.bf16 %v502_v16, %v500_v28  ;;  %v650_v56 = vadd.bf16 %v618_v59, %v586_v36 }
  0xc5   :  { %449 = vperm.xlu1 %1966, %v2444_v43   ;;  %v556_v57 = vpack.c.bf16 %v498_v60, %v496_v3  ;;  %v557_v51 = vpack.c.bf16 %v499_v38, %v497_v4  ;;  %v268_v38 = vsub.f32 %v2578_v31, %v2517_v63  ;;  %v266_v63 = vsub.f32 %v2578_v31, %v2537_v9 }
  0xc6   :  { %v2644_v27 = vpop.permute.xlu0 %250  ;;  %v588_v4 = vmul.bf16 %v321_v35, %v321_v35 }
  0xc7   :  { %3343 = vst [vmem:[#allocation17_spill] sm:$0xff] %v2644_v27  ;;  %v619_v27 = vmul.bf16 %v555_v58, %v555_v58  ;;  %v620_v52 = vmul.bf16 %v556_v57, %v556_v57  ;;  %v621_v60 = vmul.bf16 %v557_v51, %v557_v51  ;;  %v324_v10 = vpack.c.bf16 %v268_v38, %v266_v63 }
  0xc8   :  { %v802_v43 = vpop.permute.xlu1 %801 }
  0xc9   :  { %453 = vperm.xlu1 %1966, %v2360_v20   ;;  %v503_v20 = vsub.f32 %v2584_v33, %v2548_v14  ;;  %v501_v14 = vsub.f32 %v2584_v33, %v2543_v11  ;;  %v651_v3 = vadd.bf16 %v619_v27, %v587_v40  ;;  %v3345_v11 = vmov 0  }
  0xcb   :  { %v683_v0 = vpop.permute.xlu0 %682 }
  0xcc   :  { %v760_v15 = vmul.bf16 %v683_v0, %v648_v61  ;;  %v761_v19 = vmul.bf16 %v683_v0, %v649_v18  ;;  %v559_v61 = vpack.c.bf16 %v503_v20, %v501_v14  ;;  %v589_v18 = vmul.bf16 %v322_v29, %v322_v29 }
  0xcd   :  { %1967 = vset.pattern.permute.xlu1 %v3344_v46  ;;  %v2668_v22 = vpop.permute.xlu1 %145  ;;  %v323_v0 = vpack.c.bf16 %v267_v62, %v265_v17  ;;  %v622_v29 = vmul.bf16 %v558_v2, %v558_v2 }
  0xce   :  { %v856_v58 = vadd.bf16 %v2529_v6, %v760_v15  ;;  %v857_v13 = vadd.bf16 %v2529_v6, %v761_v19  ;;  %829 = vperm.xlu1 %1967, %v2427_v39   ;;  %v652_v6 = vadd.bf16 %v620_v52, %v588_v4  ;;  %v653_v39 = vadd.bf16 %v621_v60, %v589_v18 }
  0xcf   :  { %v688_v45 = vpop.permute.xlu0 %687  ;;  %v623_v59 = vmul.bf16 %v559_v61, %v559_v61  ;;  %v590_v20 = vmul.bf16 %v323_v0, %v323_v0  ;;  %v591_v52 = vmul.bf16 %v324_v10, %v324_v10  ;;  %v506_v18 = vsub.f32 %v2581_v32, %v2632_v42 }
  0xd0   :  { %v889_v57 = vmul.bf16 1069105081, %v856_v58  ;;  %v892_v51 = vmul.bf16 1069105081, %v857_v13  ;;  %v762_v9 = vmul.bf16 %v688_v45, %v650_v56  ;;  %v763_v12 = vmul.bf16 %v688_v45, %v651_v3 }
  0xd1   :  { %v654_v63 = vadd.bf16 %v622_v29, %v590_v20  ;;  %v655_v14 = vadd.bf16 %v623_v59, %v591_v52  ;;  %v271_v3 = vsub.f32 %v2575_v30, %v2522_v1 }
  0xd2   :  { %2034 = vpow.bf16 %v889_v57  ;;  %1968 = vset.pattern.permute.xlu1 %v3345_v11  ;;  %v2678_v15 = vpop.permute.xlu1 %401  ;;  %v858_v16 = vadd.bf16 %v2566_v26, %v762_v9  ;;  %v859_v35 = vadd.bf16 %v2566_v26, %v763_v12  ;;  %v2255_v57 = vmov 1065172861  }
  0xd3   :  { %2036 = vpow.bf16 %v892_v51  ;;  %v693_v27 = vpop.permute.xlu0 %692  ;;  %215 = vperm.xlu1 %1968, %v2461_v47   ;;  %v269_v9 = vsub.f32 %v2575_v30, %v2587_v34 }
  0xd4   :  { %v764_v36 = vmul.bf16 %v693_v27, %v652_v6  ;;  %v765_v40 = vmul.bf16 %v693_v27, %v653_v39  ;;  %v895_v62 = vmul.bf16 1069105081, %v858_v16  ;;  %v898_v38 = vmul.bf16 1069105081, %v859_v35 }
  0xd5   :  { %v270_v6 = vsub.f32 %v2578_v31, %v2587_v34  ;;  %v504_v16 = vsub.f32 %v2581_v32, %v2611_v37 }
  0xd6   :  { %v860_v19 = vadd.bf16 %v802_v43, %v764_v36  ;;  %v861_v17 = vadd.bf16 %v802_v43, %v765_v40  ;;  %v2683_v28 = vpop.permute.xlu1 %405  ;;  %2038 = vpow.bf16 %v895_v62 }
  0xd7   :  { %v698_v60 = vpop.permute.xlu0 %697  ;;  %1969 = vset.pattern.permute.xlu1 %v3342_v55  ;;  %2040 = vpow.bf16 %v898_v38  ;;  %v560_v29 = vpack.c.bf16 %v506_v18, %v504_v16  ;;  %v325_v38 = vpack.c.bf16 %v271_v3, %v269_v9 }
  0xd8   :  { %v901_v12 = vmul.bf16 1069105081, %v860_v19  ;;  %v904_v26 = vmul.bf16 1069105081, %v861_v17  ;;  %457 = vperm.xlu1 %1969, %v2461_v47   ;;  %v766_v58 = vmul.bf16 %v698_v60, %v654_v63  ;;  %v767_v13 = vmul.bf16 %v698_v60, %v655_v14 }
  0xd9   :  { %v272_v47 = vsub.f32 %v2578_v31, %v2522_v1  ;;  %v624_v60 = vmul.bf16 %v560_v29, %v560_v29  ;;  %v592_v14 = vmul.bf16 %v325_v38, %v325_v38  ;;  %v510_v29 = vsub.f32 %v2581_v32, %v2683_v28 }
  0xda   :  { %2042 = vpow.bf16 %v901_v12 }
  0xdb   :  { %2044 = vpow.bf16 %v904_v26  ;;  %v806_v2 = vpop.permute.xlu1 %805 }
  0xdc   :  { %v862_v43 = vadd.bf16 %v806_v2, %v766_v58  ;;  %v863_v45 = vadd.bf16 %v806_v2, %v767_v13  ;;  %461 = vperm.xlu1 %1969, %v2367_v21   ;;  %v507_v21 = vsub.f32 %v2584_v33, %v2632_v42  ;;  %v505_v42 = vsub.f32 %v2584_v33, %v2611_v37 }
  0xdd   :  { %v2035_v10 = vpop.eup %2034  ;;  %v326_v37 = vpack.c.bf16 %v272_v47, %v270_v6 }
  0xde   :  { %v2037_v56 = vpop.eup %2036  ;;  %v907_v4 = vmul.bf16 1069105081, %v862_v43  ;;  %v910_v61 = vmul.bf16 1069105081, %v863_v45  ;;  %v2691_v51 = vmin.bf16 %v2255_v57, %v2035_v10  ;;  %v561_v36 = vpack.c.bf16 %v507_v21, %v505_v42  ;;  %v703_v43 = vpop.permute.xlu0 %702 }
  0xdf   :  { %v2700_v0 = vmin.bf16 %v2255_v57, %v2037_v56  ;;  %v593_v58 = vmul.bf16 %v326_v37, %v326_v37  ;;  %v656_v10 = vadd.bf16 %v624_v60, %v592_v14 }
  0xe0   :  { %2046 = vpow.bf16 %v907_v4  ;;  %1970 = vset.pattern.permute.xlu1 %v3344_v46  ;;  %v2707_v39 = vpop.permute.xlu1 %155  ;;  %v1016_v1 = vsub.bf16 1065369472, %v2691_v51  ;;  %v625_v63 = vmul.bf16 %v561_v36, %v561_v36  ;;  %v511_v36 = vsub.f32 %v2584_v33, %v2683_v28 }
  0xe1   :  { %2048 = vpow.bf16 %v910_v61  ;;  %833 = vperm.xlu1 %1970, %v2438_v41   ;;  %v1017_v35 = vsub.bf16 1065369472, %v2700_v0  ;;  %v2039_v27 = vpop.eup %2038  ;;  %v768_v47 = vmul.bf16 %v703_v43, %v656_v10  ;;  %v509_v28 = vsub.f32 %v2584_v33, %v2678_v15 }
  0xe2   :  { %2050 = vlog2.bf16 %v1016_v1  ;;  %v2041_v34 = vpop.eup %2040  ;;  %v2717_v40 = vmin.bf16 %v2255_v57, %v2039_v27  ;;  %v657_v56 = vadd.bf16 %v625_v63, %v593_v58 }
  0xe3   :  { %2052 = vlog2.bf16 %v1017_v35  ;;  %v2720_v59 = vmin.bf16 %v2255_v57, %v2041_v34  ;;  %v275_v34 = vsub.f32 %v2575_v30, %v2527_v5  ;;  %v563_v14 = vpack.c.bf16 %v511_v36, %v509_v28 }
  0xe4   :  { %v1018_v20 = vsub.bf16 1065369472, %v2717_v40  ;;  %v769_v18 = vmul.bf16 %v703_v43, %v657_v56 }
  0xe5   :  { %v2043_v62 = vpop.eup %2042  ;;  %1971 = vset.pattern.permute.xlu1 %v3345_v11  ;;  %v2723_v41 = vpop.permute.xlu1 %409  ;;  %v1019_v17 = vsub.bf16 1065369472, %v2720_v59 }
  0xe6   :  { %v2045_v19 = vpop.eup %2044  ;;  %225 = vperm.xlu1 %1971, %v2472_v49   ;;  %v2729_v52 = vmin.bf16 %v2255_v57, %v2043_v62  ;;  %2054 = vlog2.bf16 %v1018_v20  ;;  %v276_v62 = vsub.f32 %v2578_v31, %v2527_v5  ;;  %v273_v20 = vsub.f32 %v2575_v30, %v2668_v22 }
  0xe7   :  { %v2732_v12 = vmin.bf16 %v2255_v57, %v2045_v19  ;;  %2056 = vlog2.bf16 %v1019_v17  ;;  %v274_v19 = vsub.f32 %v2578_v31, %v2668_v22  ;;  %v508_v17 = vsub.f32 %v2581_v32, %v2678_v15 }
  0xe8   :  { %v1020_v26 = vsub.bf16 1065369472, %v2729_v52  ;;  %v327_v43 = vpack.c.bf16 %v275_v34, %v273_v20 }
  0xe9   :  { %v2735_v13 = vpop.permute.xlu1 %413  ;;  %v1021_v2 = vsub.bf16 1065369472, %v2732_v12 }
  0xea   :  { %1972 = vset.pattern.permute.xlu1 %v3342_v55  ;;  %2058 = vlog2.bf16 %v1020_v26  ;;  %v562_v26 = vpack.c.bf16 %v510_v29, %v508_v17  ;;  %v279_v17 = vsub.f32 %v2575_v30, %v2531_v7  ;;  %v514_v28 = vsub.f32 %v2581_v32, %v2735_v13 }
  0xeb   :  { %v2047_v45 = vpop.eup %2046  ;;  %465 = vperm.xlu1 %1972, %v2472_v49   ;;  %2060 = vlog2.bf16 %v1021_v2 }
  0xec   :  { %v2049_v3 = vpop.eup %2048  ;;  %v2741_v4 = vmin.bf16 %v2255_v57, %v2047_v45  ;;  %v328_v45 = vpack.c.bf16 %v276_v62, %v274_v19  ;;  %v626_v56 = vmul.bf16 %v562_v26, %v562_v26 }
  0xed   :  { %v2051_v61 = vpop.eup %2050  ;;  %v2744_v21 = vmin.bf16 %v2255_v57, %v2049_v3  ;;  %v627_v3 = vmul.bf16 %v563_v14, %v563_v14 }
  0xee   :  { %v2053_v9 = vpop.eup %2052  ;;  %v810_v6 = vpop.permute.xlu1 %809  ;;  %v1050_v1 = vmul.bf16 1060192049, %v2051_v61  ;;  %v1022_v16 = vsub.bf16 1065369472, %v2741_v4 }
  0xef   :  { %v864_v42 = vadd.bf16 %v810_v6, %v768_v47  ;;  %v865_v35 = vadd.bf16 %v810_v6, %v769_v18  ;;  %469 = vperm.xlu1 %1972, %v2377_v23   ;;  %v1053_v49 = vmul.bf16 1060192049, %v2053_v9  ;;  %v1023_v27 = vsub.bf16 1065369472, %v2744_v21 }
  0xf0   :  { %2062 = vlog2.bf16 %v1022_v16  ;;  %v594_v47 = vmul.bf16 %v327_v43, %v327_v43 }
  0xf1   :  { %v913_v38 = vmul.bf16 1069105081, %v864_v42  ;;  %v916_v37 = vmul.bf16 1069105081, %v865_v35  ;;  %1336 = vmatprep.subr.bf16.mxu0 %v1053_v49  ;;  %2064 = vlog2.bf16 %v1023_v27  ;;  %v2055_v23 = vpop.eup %2054  ;;  %v708_v35 = vpop.permute.xlu0 %707 }
  0xf2   :  { %1337 = vmatpush1.bf16.msra.mxu0 %v1050_v1  ;;  %v2057_v60 = vpop.eup %2056  ;;  %v1056_v63 = vmul.bf16 1060192049, %v2055_v23  ;;  %v658_v6 = vadd.bf16 %v626_v56, %v594_v47 }
  0xf3   :  { %2066 = vpow.bf16 %v913_v38  ;;  %1973 = vset.pattern.permute.xlu1 %v3344_v46  ;;  %v2766_v5 = vpop.permute.xlu1 %165  ;;  %v1059_v22 = vmul.bf16 1060192049, %v2057_v60  ;;  %v515_v60 = vsub.f32 %v2584_v33, %v2735_v13 }
  0xf4   :  { %2068 = vpow.bf16 %v916_v37  ;;  %837 = vperm.xlu1 %1973, %v2449_v44   ;;  %v595_v44 = vmul.bf16 %v328_v45, %v328_v45  ;;  %v770_v36 = vmul.bf16 %v708_v35, %v658_v6 }
  0xf5   :  { %v2059_v58 = vpop.eup %2058  ;;  %1338 = vmatprep.subr.bf16.mxu0 %v1059_v22  ;;  %v278_v22 = vsub.f32 %v2578_v31, %v2707_v39 }
  0xf6   :  { %v2061_v2 = vpop.eup %2060  ;;  %1339 = vmatpush1.bf16.msra.mxu0 %v1056_v63  ;;  %v1062_v10 = vmul.bf16 1060192049, %v2059_v58  ;;  %v659_v1 = vadd.bf16 %v627_v3, %v595_v44  ;;  %v280_v63 = vsub.f32 %v2578_v31, %v2531_v7  ;;  %v512_v58 = vsub.f32 %v2581_v32, %v2723_v41 }
  0xf7   :  { %v1065_v15 = vmul.bf16 1060192049, %v2061_v2  ;;  %v513_v2 = vsub.f32 %v2584_v33, %v2723_v41 }
  0xf8   :  { %1974 = vset.pattern.permute.xlu1 %v3345_v11  ;;  %v2770_v61 = vpop.permute.xlu1 %417  ;;  %v771_v62 = vmul.bf16 %v708_v35, %v659_v1  ;;  %v564_v7 = vpack.c.bf16 %v514_v28, %v512_v58 }
  0xf9   :  { %1340 = vmatprep.subr.bf16.mxu0 %v1065_v15  ;;  %235 = vperm.xlu1 %1974, %v2489_v53   ;;  %v565_v43 = vpack.c.bf16 %v515_v60, %v513_v2  ;;  %v330_v15 = vpack.c.bf16 %v280_v63, %v278_v22  ;;  %v284_v60 = vsub.f32 %v2578_v31, %v2534_v8 }
  0xfa   :  { %1341 = vmatpush1.bf16.msra.mxu0 %v1062_v10  ;;  %v628_v10 = vmul.bf16 %v564_v7, %v564_v7  ;;  %v516_v22 = vsub.f32 %v2581_v32, %v2770_v61  ;;  %v517_v58 = vsub.f32 %v2584_v33, %v2770_v61 }
  0xfb   :  { %v2063_v18 = vpop.eup %2062  ;;  %v629_v56 = vmul.bf16 %v565_v43, %v565_v43  ;;  %v597_v47 = vmul.bf16 %v330_v15, %v330_v15  ;;  %v3346_v15 = vmov 3  }
  0xfc   :  { %v2065_v9 = vpop.eup %2064  ;;  %v2773_v16 = vpop.permute.xlu1 %421  ;;  %v1068_v42 = vmul.bf16 1060192049, %v2063_v18 }
  0xfd   :  { %1975 = vset.pattern.permute.xlu1 %v3342_v55  ;;  %v1071_v49 = vmul.bf16 1060192049, %v2065_v9  ;;  %v661_v6 = vadd.bf16 %v629_v56, %v597_v47  ;;  %v519_v28 = vsub.f32 %v2584_v33, %v2773_v16 }
  0xfe   :  { %v2067_v27 = vpop.eup %2066  ;;  %473 = vperm.xlu1 %1975, %v2489_v53  }
  0xff   :  { %v2069_v34 = vpop.eup %2068  ;;  %1342 = vmatprep.subr.bf16.mxu0 %v1071_v49  ;;  %v2778_v29 = vmin.bf16 %v2255_v57, %v2067_v27  ;;  %v567_v2 = vpack.c.bf16 %v519_v28, %v517_v58 }
 0x100   :  { %1343 = vmatpush1.bf16.msra.mxu0 %v1068_v42  ;;  %v2781_v38 = vmin.bf16 %v2255_v57, %v2069_v34  ;;  %v713_v42 = vpop.permute.xlu0 %712 }
 0x101   :  { %v814_v37 = vpop.permute.xlu1 %813  ;;  %v1024_v23 = vsub.bf16 1065369472, %v2778_v29 }
 0x102   :  { %v866_v20 = vadd.bf16 %v814_v37, %v770_v36  ;;  %v867_v19 = vadd.bf16 %v814_v37, %v771_v62  ;;  %477 = vperm.xlu1 %1975, %v2384_v24   ;;  %v1025_v53 = vsub.bf16 1065369472, %v2781_v38  ;;  %v277_v24 = vsub.f32 %v2575_v30, %v2707_v39  ;;  %v64_v39 = vld [vmem:[%s3306_s1 + $0xf0] sm:$0xff] }
 0x103   :  { %2070 = vlog2.bf16 %v1024_v23  ;;  %v773_v36 = vmul.bf16 %v713_v42, %v661_v6  ;;  %v81_v61 = vpack.c.bf16 %v2390_v25, %v64_v39 }
 0x104   :  { %v919_v26 = vmul.bf16 1069105081, %v866_v20  ;;  %v922_v14 = vmul.bf16 1069105081, %v867_v19  ;;  %2072 = vlog2.bf16 %v1025_v53  ;;  %v329_v45 = vpack.c.bf16 %v279_v17, %v277_v24 }
 0x105   :  { %v283_v53 = vsub.f32 %v2575_v30, %v2534_v8  ;;  %v518_v17 = vsub.f32 %v2581_v32, %v2773_v16  ;;  %v282_v24 = vsub.f32 %v2578_v31, %v2766_v5 }
 0x106   :  { %2074 = vpow.bf16 %v919_v26  ;;  %1976 = vset.pattern.permute.xlu1 %v3344_v46  ;;  %v2803_v13 = vpop.permute.xlu1 %175  ;;  %v596_v3 = vmul.bf16 %v329_v45, %v329_v45 }
 0x107   :  { %2076 = vpow.bf16 %v922_v14  ;;  %841 = vperm.xlu1 %1976, %v2467_v48   ;;  %v281_v14 = vsub.f32 %v2575_v30, %v2766_v5  ;;  %v566_v8 = vpack.c.bf16 %v518_v17, %v516_v22  ;;  %v332_v43 = vpack.c.bf16 %v284_v60, %v282_v24 }
 0x108   :  { %v660_v9 = vadd.bf16 %v628_v10, %v596_v3  ;;  %v631_v5 = vmul.bf16 %v567_v2, %v567_v2 }
 0x109   :  { %v331_v7 = vpack.c.bf16 %v283_v53, %v281_v14  ;;  %v630_v45 = vmul.bf16 %v566_v8, %v566_v8  ;;  %v599_v3 = vmul.bf16 %v332_v43, %v332_v43 }
 0x10a   :  { %v772_v34 = vmul.bf16 %v713_v42, %v660_v9 }
 0x10b   :  { %1977 = vset.pattern.permute.xlu1 %v3345_v11  ;;  %v2810_v41 = vpop.permute.xlu1 %425  ;;  %v598_v56 = vmul.bf16 %v331_v7, %v331_v7  ;;  %v663_v9 = vadd.bf16 %v631_v5, %v599_v3 }
 0x10c   :  { %245 = vperm.xlu1 %1977, %v64_v39   ;;  %v520_v14 = vsub.f32 %v2581_v32, %v2810_v41  ;;  %v521_v24 = vsub.f32 %v2584_v33, %v2810_v41 }
 0x10e   :  { %v2071_v44 = vpop.eup %2070 }
 0x10f   :  { %v2073_v18 = vpop.eup %2072  ;;  %v2812_v48 = vpop.permute.xlu1 %429  ;;  %v1074_v1 = vmul.bf16 1060192049, %v2071_v44 }
 0x110   :  { %1979 = vset.pattern.permute.xlu1 %v3342_v55  ;;  %v1077_v35 = vmul.bf16 1060192049, %v2073_v18  ;;  %v662_v18 = vadd.bf16 %v630_v45, %v598_v56  ;;  %v522_v53 = vsub.f32 %v2581_v32, %v2812_v48  ;;  %v523_v17 = vsub.f32 %v2584_v33, %v2812_v48 }
 0x111   :  { %v2075_v49 = vpop.eup %2074  ;;  %481 = vperm.xlu1 %1979, %v64_v39  }
 0x112   :  { %v2077_v27 = vpop.eup %2076  ;;  %1344 = vmatprep.subr.bf16.mxu0 %v1077_v35  ;;  %v2816_v11 = vmin.bf16 %v2255_v57, %v2075_v49  ;;  %v568_v22 = vpack.c.bf16 %v522_v53, %v520_v14  ;;  %v569_v58 = vpack.c.bf16 %v523_v17, %v521_v24 }
 0x113   :  { %1345 = vmatpush1.bf16.msra.mxu0 %v1074_v1  ;;  %v2819_v62 = vmin.bf16 %v2255_v57, %v2077_v27  ;;  %v718_v1 = vpop.permute.xlu0 %717 }
 0x114   :  { %v818_v37 = vpop.permute.xlu1 %817  ;;  %v1026_v23 = vsub.bf16 1065369472, %v2816_v11  ;;  %v632_v7 = vmul.bf16 %v568_v22, %v568_v22  ;;  %v633_v43 = vmul.bf16 %v569_v58, %v569_v58 }
 0x115   :  { %v868_v20 = vadd.bf16 %v818_v37, %v772_v34  ;;  %v869_v19 = vadd.bf16 %v818_v37, %v773_v36  ;;  %485 = vperm.xlu1 %1979, %v2390_v25   ;;  %v1027_v55 = vsub.bf16 1065369472, %v2819_v62  ;;  %v774_v25 = vmul.bf16 %v718_v1, %v662_v18 }
 0x116   :  { %2078 = vlog2.bf16 %v1026_v23 }
 0x117   :  { %v925_v63 = vmul.bf16 1069105081, %v868_v20  ;;  %v928_v26 = vmul.bf16 1069105081, %v869_v19  ;;  %2080 = vlog2.bf16 %v1027_v55  ;;  %v3347_v19 = vld [vmem:[#allocation7_spill] sm:$0xff] }
 0x118   :  { %v287_v55 = vsub.f32 %v2575_v30, %v3347_v19 }
 0x119   :  { %2082 = vpow.bf16 %v925_v63  ;;  %1980 = vset.pattern.permute.xlu1 %v3344_v46  ;;  %v2841_v16 = vpop.permute.xlu1 %185  ;;  %v285_v63 = vsub.f32 %v2575_v30, %v2803_v13 }
 0x11a   :  { %2084 = vpow.bf16 %v928_v26  ;;  %845 = vperm.xlu1 %1980, %v2477_v50   ;;  %v286_v26 = vsub.f32 %v2578_v31, %v2803_v13 }
 0x11b   :  { %v333_v8 = vpack.c.bf16 %v287_v55, %v285_v63 }
 0x11d   :  { %v600_v5 = vmul.bf16 %v333_v8, %v333_v8 }
 0x11e   :  { %1981 = vset.pattern.permute.xlu1 %v3346_v15  ;;  %v2845_v10 = vpop.permute.xlu1 %433 }
 0x11f   :  { %752 = vperm.xlu1 %1981, %v2493_v54   ;;  %v775_v54 = vmul.bf16 %v718_v1, %v663_v9  ;;  %v664_v56 = vadd.bf16 %v632_v7, %v600_v5  ;;  %v524_v63 = vsub.f32 %v2581_v32, %v2845_v10 }
 0x121   :  { %v2079_v47 = vpop.eup %2078 }
 0x122   :  { %v2081_v44 = vpop.eup %2080  ;;  %v2849_v6 = vpop.permute.xlu1 %437  ;;  %v1080_v50 = vmul.bf16 1060192049, %v2079_v47 }
 0x123   :  { %757 = vperm.xlu1 %1981, %v81_v61   ;;  %v1083_v42 = vmul.bf16 1060192049, %v2081_v44  ;;  %v723_v44 = vpop.permute.xlu0 %722  ;;  %v527_v55 = vsub.f32 %v2584_v33, %v2849_v6 }
 0x124   :  { %v2083_v35 = vpop.eup %2082 }
 0x125   :  { %v2085_v49 = vpop.eup %2084  ;;  %1346 = vmatprep.subr.bf16.mxu0 %v1083_v42  ;;  %v2852_v27 = vmin.bf16 %v2255_v57, %v2083_v35  ;;  %v776_v42 = vmul.bf16 %v723_v44, %v664_v56 }
 0x126   :  { %1347 = vmatpush1.bf16.msra.mxu0 %v1080_v50  ;;  %v2855_v39 = vmin.bf16 %v2255_v57, %v2085_v49 }
 0x127   :  { %1983 = vset.pattern.permute.xlu1 %v3344_v46  ;;  %v822_v34 = vpop.permute.xlu1 %821  ;;  %v1028_v36 = vsub.bf16 1065369472, %v2852_v27  ;;  %v288_v46 = vsub.f32 %v2578_v31, %v3347_v19  ;;  %v526_v19 = vsub.f32 %v2581_v32, %v2849_v6 }
 0x128   :  { %v870_v37 = vadd.bf16 %v822_v34, %v774_v25  ;;  %v871_v23 = vadd.bf16 %v822_v34, %v775_v54  ;;  %853 = vperm.xlu1 %1983, %v81_v61   ;;  %v1029_v20 = vsub.bf16 1065369472, %v2855_v39 }
 0x129   :  { %2086 = vlog2.bf16 %v1028_v36  ;;  %v334_v2 = vpack.c.bf16 %v288_v46, %v286_v26  ;;  %v525_v26 = vsub.f32 %v2584_v33, %v2845_v10  ;;  %v570_v14 = vpack.c.bf16 %v526_v19, %v524_v63  ;;  %v3349_v63 = vld [vmem:[#allocation10_spill] sm:$0xff] }
 0x12a   :  { %v931_v28 = vmul.bf16 1069105081, %v870_v37  ;;  %v934_v60 = vmul.bf16 1069105081, %v871_v23  ;;  %2088 = vlog2.bf16 %v1029_v20  ;;  %v3348_v23 = vld [vmem:[#allocation8_spill] sm:$0xff] }
 0x12b   :  { %v601_v13 = vmul.bf16 %v334_v2, %v334_v2  ;;  %v291_v20 = vsub.f32 %v2575_v30, %v3348_v23  ;;  %v292_v53 = vsub.f32 %v2578_v31, %v3348_v23  ;;  %v571_v24 = vpack.c.bf16 %v527_v55, %v525_v26 }
 0x12c   :  { %2090 = vpow.bf16 %v931_v28  ;;  %v2876_v48 = vpop.permute.xlu1 %195  ;;  %v289_v28 = vsub.f32 %v2575_v30, %v2841_v16  ;;  %v634_v8 = vmul.bf16 %v570_v14, %v570_v14  ;;  %v296_v14 = vsub.f32 %v2578_v31, %v3349_v63 }
 0x12d   :  { %2092 = vpow.bf16 %v934_v60  ;;  %v665_v3 = vadd.bf16 %v633_v43, %v601_v13  ;;  %v290_v60 = vsub.f32 %v2578_v31, %v2841_v16  ;;  %v635_v2 = vmul.bf16 %v571_v24, %v571_v24 }
 0x12e   :  { %v335_v22 = vpack.c.bf16 %v291_v20, %v289_v28 }
 0x12f   :  { %v777_v35 = vmul.bf16 %v723_v44, %v665_v3  ;;  %v336_v58 = vpack.c.bf16 %v292_v53, %v290_v60  ;;  %v728_v3 = vpop.permute.xlu0 %727 }
 0x130   :  { %v602_v43 = vmul.bf16 %v335_v22, %v335_v22 }
 0x131   :  { %v2878_v45 = vpop.permute.xlu1 %441  ;;  %v603_v16 = vmul.bf16 %v336_v58, %v336_v58 }
 0x132   :  { %v528_v28 = vsub.f32 %v2581_v32, %v2878_v45  ;;  %v529_v60 = vsub.f32 %v2584_v33, %v2878_v45 }
 0x134   :  { %v2087_v15 = vpop.eup %2086 }
 0x135   :  { %v2089_v61 = vpop.eup %2088  ;;  %v2880_v47 = vpop.permute.xlu1 %445  ;;  %v1086_v41 = vmul.bf16 1060192049, %v2087_v15  ;;  %v666_v15 = vadd.bf16 %v634_v8, %v602_v43 }
 0x136   :  { %v1089_v18 = vmul.bf16 1060192049, %v2089_v61  ;;  %v667_v61 = vadd.bf16 %v635_v2, %v603_v16  ;;  %v530_v20 = vsub.f32 %v2581_v32, %v2880_v47  ;;  %v531_v19 = vsub.f32 %v2584_v33, %v2880_v47 }
 0x137   :  { %v2091_v9 = vpop.eup %2090  ;;  %v295_v47 = vsub.f32 %v2575_v30, %v3349_v63 }
 0x138   :  { %v2093_v50 = vpop.eup %2092  ;;  %1348 = vmatprep.subr.bf16.mxu0 %v1089_v18  ;;  %v2883_v1 = vmin.bf16 %v2255_v57, %v2091_v9  ;;  %v572_v24 = vpack.c.bf16 %v530_v20, %v528_v28  ;;  %v573_v22 = vpack.c.bf16 %v531_v19, %v529_v60 }
 0x139   :  { %1349 = vmatpush1.bf16.msra.mxu0 %v1086_v41  ;;  %v2886_v49 = vmin.bf16 %v2255_v57, %v2093_v50  ;;  %v778_v50 = vmul.bf16 %v728_v3, %v666_v15 }
 0x13a   :  { %v826_v25 = vpop.permute.xlu1 %825  ;;  %v1030_v54 = vsub.bf16 1065369472, %v2883_v1  ;;  %v636_v8 = vmul.bf16 %v572_v24, %v572_v24  ;;  %v637_v2 = vmul.bf16 %v573_v22, %v573_v22 }
 0x13b   :  { %v872_v34 = vadd.bf16 %v826_v25, %v776_v42  ;;  %v873_v36 = vadd.bf16 %v826_v25, %v777_v35  ;;  %v1031_v37 = vsub.bf16 1065369472, %v2886_v49  ;;  %v779_v42 = vmul.bf16 %v728_v3, %v667_v61 }
 0x13c   :  { %2094 = vlog2.bf16 %v1030_v54 }
 0x13d   :  { %v937_v17 = vmul.bf16 1069105081, %v872_v34  ;;  %v940_v46 = vmul.bf16 1069105081, %v873_v36  ;;  %2096 = vlog2.bf16 %v1031_v37  ;;  %v1986_v34 = vld [vmem:[%s3308_s3 + $0x4] ss:$8 sps:$4 sm:$0xff]  }
 0x13e   :  { %1368 = vmatprep.mubr.bf16.mxu0 %v1986_v34 }
 0x13f   :  { %2098 = vpow.bf16 %v937_v17  ;;  %v2906_v6 = vpop.permute.xlu1 %205  ;;  %v293_v17 = vsub.f32 %v2575_v30, %v2876_v48 }
 0x140   :  { %2100 = vpow.bf16 %v940_v46  ;;  %v294_v46 = vsub.f32 %v2578_v31, %v2876_v48  ;;  %v297_v28 = vsub.f32 %v2575_v30, %v2906_v6  ;;  %v298_v60 = vsub.f32 %v2578_v31, %v2906_v6 }
 0x141   :  { %v337_v58 = vpack.c.bf16 %v295_v47, %v293_v17 }
 0x142   :  { %v338_v48 = vpack.c.bf16 %v296_v14, %v294_v46  ;;  %v3350_v14 = vld [vmem:[#allocation13_spill] sm:$0xff] }
 0x143   :  { %v604_v16 = vmul.bf16 %v337_v58, %v337_v58  ;;  %v299_v24 = vsub.f32 %v2575_v30, %v3350_v14  ;;  %v300_v22 = vsub.f32 %v2578_v31, %v3350_v14 }
 0x144   :  { %v2908_v7 = vpop.permute.xlu1 %449  ;;  %v605_v45 = vmul.bf16 %v338_v48, %v338_v48 }
 0x145   :  { %v668_v15 = vadd.bf16 %v636_v8, %v604_v16  ;;  %v532_v63 = vsub.f32 %v2581_v32, %v2908_v7  ;;  %v533_v47 = vsub.f32 %v2584_v33, %v2908_v7  ;;  %v339_v8 = vpack.c.bf16 %v299_v24, %v297_v28 }
 0x146   :  { %v669_v61 = vadd.bf16 %v637_v2, %v605_v45  ;;  %v340_v6 = vpack.c.bf16 %v300_v22, %v298_v60 }
 0x147   :  { %v2095_v5 = vpop.eup %2094 }
 0x148   :  { %v2097_v13 = vpop.eup %2096  ;;  %v2910_v56 = vpop.permute.xlu1 %453  ;;  %v1092_v10 = vmul.bf16 1060192049, %v2095_v5  ;;  %v607_v7 = vmul.bf16 %v340_v6, %v340_v6 }
 0x149   :  { %v1095_v41 = vmul.bf16 1060192049, %v2097_v13 }
 0x14a   :  { %v2099_v44 = vpop.eup %2098 }
 0x14b   :  { %v2101_v18 = vpop.eup %2100  ;;  %1350 = vmatprep.subr.bf16.mxu0 %v1095_v41  ;;  %v2913_v9 = vmin.bf16 %v2255_v57, %v2099_v44  ;;  %v733_v41 = vpop.permute.xlu0 %732 }
 0x14c   :  { %1351 = vmatpush1.bf16.msra.mxu0 %v1092_v10  ;;  %v2916_v35 = vmin.bf16 %v2255_v57, %v2101_v18 }
 0x14d   :  { %v830_v25 = vpop.permute.xlu1 %829  ;;  %v1032_v54 = vsub.bf16 1065369472, %v2913_v9 }
 0x14e   :  { %v874_v36 = vadd.bf16 %v830_v25, %v778_v50  ;;  %v875_v37 = vadd.bf16 %v830_v25, %v779_v42  ;;  %v1033_v23 = vsub.bf16 1065369472, %v2916_v35  ;;  %v780_v25 = vmul.bf16 %v733_v41, %v668_v15 }
 0x14f   :  { %2102 = vlog2.bf16 %v1032_v54  ;;  %v781_v54 = vmul.bf16 %v733_v41, %v669_v61 }
 0x150   :  { %v943_v55 = vmul.bf16 1069105081, %v874_v36  ;;  %v946_v53 = vmul.bf16 1069105081, %v875_v37  ;;  %2104 = vlog2.bf16 %v1033_v23 }
 0x152   :  { %2106 = vpow.bf16 %v943_v55  ;;  %v2937_v26 = vpop.permute.xlu1 %215  ;;  %v534_v55 = vsub.f32 %v2581_v32, %v2910_v56 }
 0x153   :  { %2108 = vpow.bf16 %v946_v53  ;;  %v535_v53 = vsub.f32 %v2584_v33, %v2910_v56  ;;  %v301_v14 = vsub.f32 %v2575_v30, %v2937_v26  ;;  %v302_v24 = vsub.f32 %v2578_v31, %v2937_v26 }
 0x154   :  { %v574_v58 = vpack.c.bf16 %v534_v55, %v532_v63 }
 0x155   :  { %v575_v48 = vpack.c.bf16 %v535_v53, %v533_v47 }
 0x156   :  { %v638_v2 = vmul.bf16 %v574_v58, %v574_v58 }
 0x157   :  { %v2941_v43 = vpop.permute.xlu1 %457  ;;  %v639_v16 = vmul.bf16 %v575_v48, %v575_v48  ;;  %v3351_v48 = vld [vmem:[#allocation14_spill] sm:$0xff] }
 0x158   :  { %v536_v22 = vsub.f32 %v2581_v32, %v2941_v43  ;;  %v537_v58 = vsub.f32 %v2584_v33, %v2941_v43  ;;  %v304_v6 = vsub.f32 %v2578_v31, %v3351_v48 }
 0x15a   :  { %v2103_v5 = vpop.eup %2102  ;;  %v342_v26 = vpack.c.bf16 %v304_v6, %v302_v24 }
 0x15b   :  { %v2105_v13 = vpop.eup %2104  ;;  %v2943_v10 = vpop.permute.xlu1 %461  ;;  %v1098_v3 = vmul.bf16 1060192049, %v2103_v5  ;;  %v606_v5 = vmul.bf16 %v339_v8, %v339_v8  ;;  %v303_v8 = vsub.f32 %v2575_v30, %v3351_v48 }
 0x15c   :  { %v1101_v44 = vmul.bf16 1060192049, %v2105_v13  ;;  %v538_v28 = vsub.f32 %v2581_v32, %v2943_v10  ;;  %v539_v60 = vsub.f32 %v2584_v33, %v2943_v10 }
 0x15d   :  { %v2107_v18 = vpop.eup %2106  ;;  %v670_v61 = vadd.bf16 %v638_v2, %v606_v5  ;;  %v341_v5 = vpack.c.bf16 %v303_v8, %v301_v14 }
 0x15e   :  { %v2109_v50 = vpop.eup %2108  ;;  %1352 = vmatprep.subr.bf16.mxu0 %v1101_v44  ;;  %v2946_v42 = vmin.bf16 %v2255_v57, %v2107_v18  ;;  %v738_v18 = vpop.permute.xlu0 %737  ;;  %v576_v2 = vpack.c.bf16 %v538_v28, %v536_v22 }
 0x15f   :  { %1353 = vmatpush1.bf16.msra.mxu0 %v1098_v3  ;;  %v2949_v34 = vmin.bf16 %v2255_v57, %v2109_v50  ;;  %v671_v3 = vadd.bf16 %v639_v16, %v607_v7  ;;  %v577_v16 = vpack.c.bf16 %v539_v60, %v537_v58 }
 0x160   :  { %v834_v36 = vpop.permute.xlu1 %833  ;;  %v1034_v37 = vsub.bf16 1065369472, %v2946_v42  ;;  %v640_v7 = vmul.bf16 %v576_v2, %v576_v2 }
 0x161   :  { %v876_v23 = vadd.bf16 %v834_v36, %v780_v25  ;;  %v877_v20 = vadd.bf16 %v834_v36, %v781_v54  ;;  %v1035_v19 = vsub.bf16 1065369472, %v2949_v34 }
 0x162   :  { %2110 = vlog2.bf16 %v1034_v37  ;;  %v782_v37 = vmul.bf16 %v738_v18, %v670_v61  ;;  %v608_v61 = vmul.bf16 %v341_v5, %v341_v5  ;;  %v3352_v5 = vld [vmem:[#allocation15_spill] sm:$0xff] }
 0x163   :  { %v949_v17 = vmul.bf16 1069105081, %v876_v23  ;;  %v952_v46 = vmul.bf16 1069105081, %v877_v20  ;;  %2112 = vlog2.bf16 %v1035_v19  ;;  %v783_v23 = vmul.bf16 %v738_v18, %v671_v3 }
 0x164   :  { %v609_v3 = vmul.bf16 %v342_v26, %v342_v26  ;;  %v672_v18 = vadd.bf16 %v640_v7, %v608_v61  ;;  %v307_v26 = vsub.f32 %v2575_v30, %v3352_v5  ;;  %v308_v7 = vsub.f32 %v2578_v31, %v3352_v5 }
 0x165   :  { %2114 = vpow.bf16 %v949_v17  ;;  %v2967_v56 = vpop.permute.xlu1 %225 }
 0x166   :  { %2116 = vpow.bf16 %v952_v46  ;;  %v305_v24 = vsub.f32 %v2575_v30, %v2967_v56  ;;  %v306_v8 = vsub.f32 %v2578_v31, %v2967_v56 }
 0x16a   :  { %v2971_v45 = vpop.permute.xlu1 %465 }
 0x16b   :  { %v540_v6 = vsub.f32 %v2581_v32, %v2971_v45  ;;  %v541_v2 = vsub.f32 %v2584_v33, %v2971_v45 }
 0x16d   :  { %v2111_v13 = vpop.eup %2110 }
 0x16e   :  { %v2113_v15 = vpop.eup %2112  ;;  %v2973_v41 = vpop.permute.xlu1 %469  ;;  %v1104_v44 = vmul.bf16 1060192049, %v2111_v13  ;;  %v641_v13 = vmul.bf16 %v577_v16, %v577_v16 }
 0x16f   :  { %v1107_v50 = vmul.bf16 1060192049, %v2113_v15  ;;  %v542_v60 = vsub.f32 %v2581_v32, %v2973_v41 }
 0x170   :  { %v2115_v25 = vpop.eup %2114 }
 0x171   :  { %v2117_v54 = vpop.eup %2116  ;;  %1354 = vmatprep.subr.bf16.mxu0 %v1107_v50  ;;  %v2976_v36 = vmin.bf16 %v2255_v57, %v2115_v25  ;;  %v673_v50 = vadd.bf16 %v641_v13, %v609_v3  ;;  %v578_v13 = vpack.c.bf16 %v542_v60, %v540_v6  ;;  %v343_v3 = vpack.c.bf16 %v307_v26, %v305_v24 }
 0x172   :  { %1355 = vmatpush1.bf16.msra.mxu0 %v1104_v44  ;;  %v2979_v20 = vmin.bf16 %v2255_v57, %v2117_v54 }
 0x173   :  { %v838_v19 = vpop.permute.xlu1 %837  ;;  %v1036_v55 = vsub.bf16 1065369472, %v2976_v36 }
 0x174   :  { %v878_v53 = vadd.bf16 %v838_v19, %v782_v37  ;;  %v879_v17 = vadd.bf16 %v838_v19, %v783_v23  ;;  %v1037_v46 = vsub.bf16 1065369472, %v2979_v20  ;;  %v743_v37 = vpop.permute.xlu0 %742 }
 0x175   :  { %2118 = vlog2.bf16 %v1036_v55 }
 0x176   :  { %v955_v63 = vmul.bf16 1069105081, %v878_v53  ;;  %v958_v47 = vmul.bf16 1069105081, %v879_v17  ;;  %2120 = vlog2.bf16 %v1037_v46  ;;  %v784_v17 = vmul.bf16 %v743_v37, %v672_v18 }
 0x177   :  { %v785_v46 = vmul.bf16 %v743_v37, %v673_v50  ;;  %v610_v18 = vmul.bf16 %v343_v3, %v343_v3 }
 0x178   :  { %2122 = vpow.bf16 %v955_v63  ;;  %v2997_v10 = vpop.permute.xlu1 %235  ;;  %v543_v63 = vsub.f32 %v2584_v33, %v2973_v41  ;;  %v748_v6 = vpop.permute.xlu0 %747 }
 0x179   :  { %2124 = vpow.bf16 %v958_v47 }
 0x17a   :  { %v579_v61 = vpack.c.bf16 %v543_v63, %v541_v2  ;;  %v309_v63 = vsub.f32 %v2575_v30, %v2997_v10 }
 0x17c   :  { %v643_v45 = vmul.bf16 %v579_v61, %v579_v61 }
 0x17d   :  { %v474_v15 = vpop.permute.xlu1 %473 }
 0x180   :  { %v2119_v43 = vpop.eup %2118 }
 0x181   :  { %v2121_v44 = vpop.eup %2120  ;;  %v478_v25 = vpop.permute.xlu1 %477  ;;  %v1110_v54 = vmul.bf16 1060192049, %v2119_v43  ;;  %v344_v43 = vpack.c.bf16 %v308_v7, %v306_v8 }
 0x182   :  { %v1113_v23 = vmul.bf16 1060192049, %v2121_v44  ;;  %v642_v44 = vmul.bf16 %v578_v13, %v578_v13  ;;  %v547_v37 = vsub.f32 %v2584_v33, %v478_v25 }
 0x183   :  { %v2123_v19 = vpop.eup %2122  ;;  %v611_v50 = vmul.bf16 %v344_v43, %v344_v43 }
 0x184   :  { %v2125_v55 = vpop.eup %2124  ;;  %1356 = vmatprep.subr.bf16.mxu0 %v1113_v23  ;;  %v3002_v53 = vmin.bf16 %v2255_v57, %v2123_v19  ;;  %v544_v19 = vsub.f32 %v2581_v32, %v474_v15 }
 0x185   :  { %1357 = vmatpush1.bf16.msra.mxu0 %v1110_v54  ;;  %v3005_v28 = vmin.bf16 %v2255_v57, %v2125_v55  ;;  %v546_v54 = vsub.f32 %v2581_v32, %v478_v25  ;;  %v545_v55 = vsub.f32 %v2584_v33, %v474_v15  ;;  %v3353_v25 = vld [vmem:[#allocation16_spill] sm:$0xff] }
 0x186   :  { %v842_v47 = vpop.permute.xlu1 %841  ;;  %v1038_v14 = vsub.bf16 1065369472, %v3002_v53  ;;  %v311_v8 = vsub.f32 %v2575_v30, %v3353_v25  ;;  %v312_v15 = vsub.f32 %v2578_v31, %v3353_v25 }
 0x187   :  { %v880_v22 = vadd.bf16 %v842_v47, %v784_v17  ;;  %v881_v58 = vadd.bf16 %v842_v47, %v785_v46  ;;  %v1039_v48 = vsub.bf16 1065369472, %v3005_v28  ;;  %v674_v17 = vadd.bf16 %v642_v44, %v610_v18 }
 0x188   :  { %2126 = vlog2.bf16 %v1038_v14  ;;  %v675_v46 = vadd.bf16 %v643_v45, %v611_v50  ;;  %v310_v47 = vsub.f32 %v2578_v31, %v2997_v10  ;;  %v580_v24 = vpack.c.bf16 %v546_v54, %v544_v19 }
 0x189   :  { %v961_v41 = vmul.bf16 1069105081, %v880_v22  ;;  %v964_v16 = vmul.bf16 1069105081, %v881_v58  ;;  %2128 = vlog2.bf16 %v1039_v48  ;;  %v581_v22 = vpack.c.bf16 %v547_v37, %v545_v55 }
 0x18a   :  { %v786_v26 = vmul.bf16 %v748_v6, %v674_v17  ;;  %v787_v7 = vmul.bf16 %v748_v6, %v675_v46  ;;  %v345_v61 = vpack.c.bf16 %v311_v8, %v309_v63  ;;  %v346_v3 = vpack.c.bf16 %v312_v15, %v310_v47  ;;  %v850_v6 = vpop.permute.xlu0 %849 }
 0x18b   :  { %2130 = vpow.bf16 %v961_v41  ;;  %v3025_v56 = vpop.permute.xlu1 %245  ;;  %v644_v45 = vmul.bf16 %v580_v24, %v580_v24  ;;  %v645_v18 = vmul.bf16 %v581_v22, %v581_v22 }
 0x18c   :  { %2132 = vpow.bf16 %v964_v16  ;;  %v3354_v16 = vld [vmem:[#allocation17_spill] sm:$0xff]  ;;  %v313_v37 = vsub.f32 %v2575_v30, %v3025_v56  ;;  %v314_v19 = vsub.f32 %v2578_v31, %v3025_v56  ;;  %v612_v24 = vmul.bf16 %v345_v61, %v345_v61 }
 0x18d   :  { %v315_v5 = vsub.f32 %v2575_v30, %v3354_v16  ;;  %v316_v10 = vsub.f32 %v2578_v31, %v3354_v16  ;;  %v613_v22 = vmul.bf16 %v346_v3, %v346_v3 }
 0x18e   :  { %v676_v31 = vadd.bf16 %v644_v45, %v612_v24 }
 0x18f   :  { %v677_v56 = vadd.bf16 %v645_v18, %v613_v22  ;;  %v348_v8 = vpack.c.bf16 %v316_v10, %v314_v19 }
 0x190   :  { %v482_v23 = vpop.permute.xlu1 %481 }
 0x191   :  { %v548_v55 = vsub.f32 %v2581_v32, %v482_v23 }
 0x193   :  { %v2127_v60 = vpop.eup %2126 }
 0x194   :  { %v2129_v14 = vpop.eup %2128  ;;  %v486_v58 = vpop.permute.xlu1 %485  ;;  %v1116_v48 = vmul.bf16 1060192049, %v2127_v60  ;;  %v549_v60 = vsub.f32 %v2584_v33, %v482_v23 }
 0x195   :  { %v1119_v2 = vmul.bf16 1060192049, %v2129_v14  ;;  %v550_v43 = vsub.f32 %v2581_v32, %v486_v58  ;;  %v551_v50 = vsub.f32 %v2584_v33, %v486_v58  ;;  %v347_v32 = vpack.c.bf16 %v315_v5, %v313_v37 }
 0x196   :  { %v2131_v41 = vpop.eup %2130 }
 0x197   :  { %v2133_v13 = vpop.eup %2132  ;;  %1358 = vmatprep.subr.bf16.mxu0 %v1119_v2  ;;  %v3045_v44 = vmin.bf16 %v2255_v57, %v2131_v41  ;;  %v582_v58 = vpack.c.bf16 %v550_v43, %v548_v55 }
 0x198   :  { %1359 = vmatpush1.bf16.msra.mxu0 %v1116_v48  ;;  %v3049_v54 = vmin.bf16 %v2255_v57, %v2133_v13  ;;  %v583_v48 = vpack.c.bf16 %v551_v50, %v549_v60  ;;  %v615_v13 = vmul.bf16 %v348_v8, %v348_v8 }
 0x199   :  { %v846_v17 = vpop.permute.xlu1 %845  ;;  %v1040_v46 = vsub.bf16 1065369472, %v3045_v44  ;;  %v646_v2 = vmul.bf16 %v582_v58, %v582_v58 }
 0x19a   :  { %v882_v63 = vadd.bf16 %v846_v17, %v786_v26  ;;  %v883_v47 = vadd.bf16 %v846_v17, %v787_v7  ;;  %v1041_v14 = vsub.bf16 1065369472, %v3049_v54  ;;  %v647_v41 = vmul.bf16 %v583_v48, %v583_v48 }
 0x19b   :  { %2134 = vlog2.bf16 %v1040_v46  ;;  %v614_v7 = vmul.bf16 %v347_v32, %v347_v32 }
 0x19c   :  { %v967_v30 = vmul.bf16 1069105081, %v882_v63  ;;  %v970_v25 = vmul.bf16 1069105081, %v883_v47  ;;  %2136 = vlog2.bf16 %v1041_v14  ;;  %v679_v45 = vadd.bf16 %v647_v41, %v615_v13 }
 0x19d   :  { %v678_v50 = vadd.bf16 %v646_v2, %v614_v7 }
 0x19e   :  { %2138 = vpow.bf16 %v967_v30  ;;  %v753_v15 = vpop.permute.xlu1 %752 }
 0x19f   :  { %2140 = vpow.bf16 %v970_v25  ;;  %v788_v33 = vmul.bf16 %v753_v15, %v676_v31  ;;  %v789_v23 = vmul.bf16 %v753_v15, %v677_v56 }
 0x1a1   :  { %v884_v16 = vadd.bf16 %v850_v6, %v788_v33  ;;  %v885_v26 = vadd.bf16 %v850_v6, %v789_v23 }
 0x1a2   :  { %v758_v61 = vpop.permute.xlu1 %757 }
 0x1a3   :  { %v973_v3 = vmul.bf16 1069105081, %v884_v16  ;;  %v976_v43 = vmul.bf16 1069105081, %v885_v26  ;;  %v790_v10 = vmul.bf16 %v758_v61, %v678_v50  ;;  %v791_v18 = vmul.bf16 %v758_v61, %v679_v45 }
 0x1a5   :  { %2142 = vpow.bf16 %v973_v3 }
 0x1a6   :  { %v2135_v5 = vpop.eup %2134  ;;  %2144 = vpow.bf16 %v976_v43 }
 0x1a7   :  { %v2137_v37 = vpop.eup %2136  ;;  %v854_v19 = vpop.permute.xlu1 %853  ;;  %v1122_v55 = vmul.bf16 1060192049, %v2135_v5 }
 0x1a8   :  { %v886_v17 = vadd.bf16 %v854_v19, %v790_v10  ;;  %v887_v46 = vadd.bf16 %v854_v19, %v791_v18  ;;  %v1125_v60 = vmul.bf16 1060192049, %v2137_v37 }
 0x1a9   :  { %v2139_v63 = vpop.eup %2138 }
 0x1aa   :  { %v2141_v47 = vpop.eup %2140  ;;  %v979_v14 = vmul.bf16 1069105081, %v886_v17  ;;  %v982_v24 = vmul.bf16 1069105081, %v887_v46  ;;  %1360 = vmatprep.subr.bf16.mxu0 %v1125_v60  ;;  %v3060_v22 = vmin.bf16 %v2255_v57, %v2139_v63  ;;  %v1987_v46 = vld [vmem:[%s3308_s3 + $0x14] ss:$8 sps:$4 sm:$0xff]  }
 0x1ab   :  { %1361 = vmatpush1.bf16.msra.mxu0 %v1122_v55  ;;  %v3063_v58 = vmin.bf16 %v2255_v57, %v2141_v47  ;;  %v1984_v55 = vld [vmem:[%s3308_s3] ss:$8 sps:$4 sm:$0xff]   ;;  %v1989_v47 = vld [vmem:[%s3308_s3 + $0x10] ss:$8 sps:$4 sm:$0xff]  }
 0x1ac   :  { %2146 = vpow.bf16 %v979_v14  ;;  %v1042_v48 = vsub.bf16 1065369472, %v3060_v22  ;;  %v1990_v14 = vld [vmem:[%s3308_s3 + $0x24] ss:$8 sps:$4 sm:$0xff]  }
 0x1ad   :  { %2148 = vpow.bf16 %v982_v24  ;;  %v1043_v30 = vsub.bf16 1065369472, %v3063_v58  ;;  %v1992_v24 = vld [vmem:[%s3308_s3 + $0x20] ss:$8 sps:$4 sm:$0xff]  }
 0x1ae   :  { %2150 = vlog2.bf16 %v1042_v48  ;;  %v1993_v48 = vld [vmem:[%s3308_s3 + $0x34] ss:$8 sps:$4 sm:$0xff]  }
 0x1af   :  { %2152 = vlog2.bf16 %v1043_v30  ;;  %v1995_v30 = vld [vmem:[%s3308_s3 + $0x30] ss:$8 sps:$4 sm:$0xff]  }
 0x1b0   :  { %v2143_v25 = vpop.eup %2142 }
 0x1b1   :  { %v2145_v31 = vpop.eup %2144  ;;  %v3068_v56 = vmin.bf16 %v2255_v57, %v2143_v25  ;;  %v1996_v25 = vld [vmem:[%s3308_s3 + $0x44] ss:$8 sps:$4 sm:$0xff]  }
 0x1b2   :  { %v3071_v32 = vmin.bf16 %v2255_v57, %v2145_v31  ;;  %v1998_v31 = vld [vmem:[%s3308_s3 + $0x40] ss:$8 sps:$4 sm:$0xff]  }
 0x1b3   :  { %v1044_v8 = vsub.bf16 1065369472, %v3068_v56 }
 0x1b4   :  { %v1045_v15 = vsub.bf16 1065369472, %v3071_v32 }
 0x1b5   :  { %2154 = vlog2.bf16 %v1044_v8  ;;  %v1999_v8 = vld [vmem:[%s3308_s3 + $0x54] ss:$8 sps:$4 sm:$0xff]  }
 0x1b6   :  { %2156 = vlog2.bf16 %v1045_v15  ;;  %v2001_v15 = vld [vmem:[%s3308_s3 + $0x50] ss:$8 sps:$4 sm:$0xff]  }
 0x1b7   :  { %v2147_v6 = vpop.eup %2146 }
 0x1b8   :  { %v2149_v33 = vpop.eup %2148  ;;  %v3076_v23 = vmin.bf16 %v2255_v57, %v2147_v6  ;;  %v2002_v6 = vld [vmem:[%s3308_s3 + $0x64] ss:$8 sps:$4 sm:$0xff]  }
 0x1b9   :  { %v2151_v2 = vpop.eup %2150  ;;  %v3079_v41 = vmin.bf16 %v2255_v57, %v2149_v33  ;;  %v2004_v33 = vld [vmem:[%s3308_s3 + $0x60] ss:$8 sps:$4 sm:$0xff]  }
 0x1ba   :  { %v2153_v16 = vpop.eup %2152  ;;  %v1128_v26 = vmul.bf16 1060192049, %v2151_v2  ;;  %v1046_v7 = vsub.bf16 1065369472, %v3076_v23  ;;  %v2005_v2 = vld [vmem:[%s3308_s3 + $0x74] ss:$8 sps:$4 sm:$0xff]  }
 0x1bb   :  { %v1131_v13 = vmul.bf16 1060192049, %v2153_v16  ;;  %v1047_v61 = vsub.bf16 1065369472, %v3079_v41  ;;  %v2007_v16 = vld [vmem:[%s3308_s3 + $0x70] ss:$8 sps:$4 sm:$0xff]  }
 0x1bc   :  { %2158 = vlog2.bf16 %v1046_v7  ;;  %v2010_v7 = vld [vmem:[%s3308_s3 + $0x80] ss:$8 sps:$4 sm:$0xff]  }
 0x1bd   :  { %1362 = vmatprep.subr.bf16.mxu0 %v1131_v13  ;;  %2160 = vlog2.bf16 %v1047_v61  ;;  %v2011_v13 = vld [vmem:[%s3308_s3 + $0x94] ss:$8 sps:$4 sm:$0xff]   ;;  %v2013_v61 = vld [vmem:[%s3308_s3 + $0x90] ss:$8 sps:$4 sm:$0xff]  }
 0x1be   :  { %1363 = vmatpush1.bf16.msra.mxu0 %v1128_v26  ;;  %v2008_v26 = vld [vmem:[%s3308_s3 + $0x84] ss:$8 sps:$4 sm:$0xff]  }
 0x1c0   :  { %v2155_v3 = vpop.eup %2154 }
 0x1c1   :  { %v2157_v43 = vpop.eup %2156  ;;  %v1134_v50 = vmul.bf16 1060192049, %v2155_v3  ;;  %v2014_v3 = vld [vmem:[%s3308_s3 + $0xa4] ss:$8 sps:$4 sm:$0xff]  }
 0x1c2   :  { %v1137_v45 = vmul.bf16 1060192049, %v2157_v43  ;;  %v2016_v43 = vld [vmem:[%s3308_s3 + $0xa0] ss:$8 sps:$4 sm:$0xff]  }
 0x1c4   :  { %1364 = vmatprep.subr.bf16.mxu0 %v1137_v45  ;;  %v2019_v45 = vld [vmem:[%s3308_s3 + $0xb0] ss:$8 sps:$4 sm:$0xff]  }
 0x1c5   :  { %1365 = vmatpush1.bf16.msra.mxu0 %v1134_v50  ;;  %v2017_v50 = vld [vmem:[%s3308_s3 + $0xb4] ss:$8 sps:$4 sm:$0xff]  }
 0x1c7   :  { %v2159_v5 = vpop.eup %2158 }
 0x1c8   :  { %v2161_v57 = vpop.eup %2160  ;;  %v1140_v10 = vmul.bf16 1060192049, %v2159_v5  ;;  %v2020_v5 = vld [vmem:[%s3308_s3 + $0xc4] ss:$8 sps:$4 sm:$0xff]  }
 0x1c9   :  { %v1143_v18 = vmul.bf16 1060192049, %v2161_v57  ;;  %v2022_v57 = vld [vmem:[%s3308_s3 + $0xc0] ss:$8 sps:$4 sm:$0xff]  }
 0x1ca   :  { %v1844_v37 = vrot.slane %v1140_v10, 4 }
 0x1cb   :  { %1366 = vmatprep.subr.bf16.mxu0 %v1143_v18  ;;  %v1845_v19 = vrot.slane %v1143_v18, 4  ;;  %v2025_v18 = vld [vmem:[%s3308_s3 + $0xd0] ss:$8 sps:$4 sm:$0xff]  }
 0x1cc   :  { %1367 = vmatpush1.bf16.msra.mxu0 %v1140_v10  ;;  %v1848_v17 = vunpack.c.l.bf16 %v1844_v37  ;;  %v2023_v10 = vld [vmem:[%s3308_s3 + $0xd4] ss:$8 sps:$4 sm:$0xff]   ;;  %v2026_v37 = vld [vmem:[%s3308_s3 + $0xe4] ss:$8 sps:$4 sm:$0xff]  }
 0x1cd   :  { %v1849_v60 = vunpack.c.l.bf16 %v1845_v19  ;;  %v2028_v19 = vld [vmem:[%s3308_s3 + $0xe0] ss:$8 sps:$4 sm:$0xff]  }
 0x1cf   :  { %v3089_v63 = vcombine.high %v1848_v17, %v1849_v60  ;;  %1369 = vmatmul.mubr.bf16.vlgmr.msra.gmra.mrb[0].mxu0 %v1984_v55  ;;  %v2029_v55 = vld [vmem:[%s3308_s3 + $0xf4] ss:$8 sps:$4 sm:$0xff]   ;;  %v2031_v17 = vld [vmem:[%s3308_s3 + $0xf0] ss:$8 sps:$4 sm:$0xff]  }
 0x1d0   :  { %1378 = vmatprep.mubr.bf16.mxu0 %v1987_v46  ;;  %v1529_v46 = vld [vmem:[#allocation2] sm:$0x3] }
 0x1d1   :  { %v3355_v60 = vld [vmem:[#allocation11_spill] sm:$0xff] }
 0x1d7   :  { %1379 = vmatmul.mubr.bf16.gmra.mrb[4].mxu0 %v1989_v47  ;;  %v3179_v47 = vrot.slane %v1529_v46, %v3355_v60 }
 0x1d8   :  { %1388 = vmatprep.mubr.bf16.mxu0 %v1990_v14 }
 0x1df   :  { %1389 = vmatmul.mubr.bf16.gmra.mrb[8].mxu0 %v1992_v24  ;;  %v3356_v24 = vld [vmem:[#allocation12_spill] sm:$0xff] }
 0x1e0   :  { %1398 = vmatprep.mubr.bf16.mxu0 %v1993_v48  ;;  %v3182_v48 = vrot.slane %v1529_v46, %v3356_v24  ;;  %v3195_v46 = vld [vmem:[%s3307_s2] sm:$0xff]  ;;  %s2257_s2 = smov [#allocation3]  }
 0x1e1   :  { %s1882_s12 = sshll.u32 %s2257_s2, 4  ;;  %s1883_s12 = int_to_ptr.vmem [resolvable:$true] %s1882_s12 }
 0x1e2   :  { %s2226_s13 = scalar_lea.vmem %s1883_s12, 256  ;;  %p2231_p1 = scmp.lt.s32.totalorder %s1883_s12, %s1883_s12 }
 0x1e3   :  { %p2227_p0 = scmp.ne.s32.totalorder %s1883_s12, %s2226_s13  ;;  %p2232_p2 = scmp.lt.s32.totalorder %s2226_s13, %s2226_s13 }
 0x1e5   :  { %p2233_p3 = por %p2232_p2, %p2231_p1 }
 0x1e7   :  { %1399 = vmatmul.mubr.bf16.gmra.mrb[12].mxu0 %v1995_v30  ;;  %p2234_p4 = pnand %p2233_p3, %p2227_p0 }
 0x1e8   :  { %1408 = vmatprep.mubr.bf16.mxu0 %v1996_v25 }
 0x1ef   :  { %1409 = vmatmul.mubr.bf16.gmra.mrb[16].mxu0 %v1998_v31 }
 0x1f0   :  { %1418 = vmatprep.mubr.bf16.mxu0 %v1999_v8 }
 0x1f7   :  { %1419 = vmatmul.mubr.bf16.gmra.mrb[20].mxu0 %v2001_v15 }
 0x1f8   :  { %1428 = vmatprep.mubr.bf16.mxu0 %v2002_v6 }
 0x1ff   :  { %1429 = vmatmul.mubr.bf16.gmra.mrb[24].mxu0 %v2004_v33 }
 0x200   :  { %1438 = vmatprep.mubr.bf16.mxu0 %v2005_v2 }
 0x207   :  { %1439 = vmatmul.mubr.bf16.gmra.mrb[28].mxu0 %v2007_v16 }
 0x208   :  { %1448 = vmatprep.mubr.bf16.mxu0 %v2008_v26 }
 0x20f   :  { %1449 = vmatmul.mubr.bf16.gmra.mrb[32].mxu0 %v2010_v7 }
 0x210   :  { %1458 = vmatprep.mubr.bf16.mxu0 %v2011_v13 }
 0x217   :  { %1459 = vmatmul.mubr.bf16.gmra.mrb[36].mxu0 %v2013_v61 }
 0x218   :  { %1468 = vmatprep.mubr.bf16.mxu0 %v2014_v3 }
 0x21f   :  { %1469 = vmatmul.mubr.bf16.gmra.mrb[40].mxu0 %v2016_v43 }
 0x220   :  { %1478 = vmatprep.mubr.bf16.mxu0 %v2017_v50 }
 0x227   :  { %1479 = vmatmul.mubr.bf16.gmra.mrb[44].mxu0 %v2019_v45 }
 0x228   :  { %1488 = vmatprep.mubr.bf16.mxu0 %v2020_v5 }
 0x22f   :  { %1489 = vmatmul.mubr.bf16.gmra.mrb[48].mxu0 %v2022_v57 }
 0x230   :  { %1498 = vmatprep.mubr.bf16.mxu0 %v2023_v10 }
 0x237   :  { %1499 = vmatmul.mubr.bf16.gmra.mrb[52].mxu0 %v2025_v18 }
 0x238   :  { %1508 = vmatprep.mubr.bf16.mxu0 %v2026_v37 }
 0x23f   :  { %1509 = vmatmul.mubr.bf16.gmra.mrb[56].mxu0 %v2028_v19 }
 0x240   :  { %1518 = vmatprep.mubr.bf16.mxu0 %v2029_v55 }
 0x247   :  { %1519 = vmatmul.mubr.bf16.gmra.mrb[60].mxu0 %v2031_v17 }
 0x2a2   :  { %v1370_v14 = vpop.f32.mrb[0].mxu0 }
 0x2a3   :  { %v1372_v30 = vpop.f32.mrb[1].mxu0  ;;  %v1541_v31 = vadd.f32 %v3179_v47, %v1370_v14  ;;  %v1924_v14 = vcombine.high %v3195_v46, %v3195_v46 }
 0x2a4   :  { %v1374_v25 = vpop.f32.mrb[2].mxu0  ;;  %v1542_v6 = vadd.f32 %v3182_v48, %v1372_v30 }
 0x2a5   :  { %v1543_v8 = vadd.f32 %v3179_v47, %v1374_v25  ;;  %v1376_v15 = vpop.f32.mrb[3].mxu0  ;;  %1807 = vmatprep.mubr.bf16.mxu1 %v1924_v14 }
 0x2a6   :  { %v1544_v33 = vadd.f32 %v3182_v48, %v1376_v15 }
 0x2a7   :  { %v1605_v2 = vpack.c.bf16 %v1543_v8, %v1541_v31 }
 0x2a8   :  { %v1606_v16 = vpack.c.bf16 %v1544_v33, %v1542_v6 }
 0x2a9   :  { %v1638_v26 = vmul.bf16 1069105081, %v1605_v2 }
 0x2aa   :  { %v1641_v7 = vmul.bf16 1069105081, %v1606_v16  ;;  %v1380_v13 = vpop.f32.mrb[4].mxu0 }
 0x2ab   :  { %2162 = vpow.bf16 %v1638_v26  ;;  %v1382_v61 = vpop.f32.mrb[5].mxu0  ;;  %v1545_v43 = vadd.f32 %v3179_v47, %v1380_v13 }
 0x2ac   :  { %2164 = vpow.bf16 %v1641_v7  ;;  %v1384_v3 = vpop.f32.mrb[6].mxu0  ;;  %v1546_v5 = vadd.f32 %v3182_v48, %v1382_v61 }
 0x2ad   :  { %v1547_v50 = vadd.f32 %v3179_v47, %v1384_v3  ;;  %v1386_v45 = vpop.f32.mrb[7].mxu0 }
 0x2ae   :  { %v1548_v57 = vadd.f32 %v3182_v48, %v1386_v45 }
 0x2af   :  { %v1607_v10 = vpack.c.bf16 %v1547_v50, %v1545_v43 }
 0x2b0   :  { %v1608_v18 = vpack.c.bf16 %v1548_v57, %v1546_v5 }
 0x2b1   :  { %v1644_v37 = vmul.bf16 1069105081, %v1607_v10 }
 0x2b2   :  { %v1647_v19 = vmul.bf16 1069105081, %v1608_v18  ;;  %v1390_v55 = vpop.f32.mrb[8].mxu0 }
 0x2b3   :  { %2166 = vpow.bf16 %v1644_v37  ;;  %v1392_v17 = vpop.f32.mrb[9].mxu0  ;;  %v1549_v24 = vadd.f32 %v3179_v47, %v1390_v55 }
 0x2b4   :  { %2168 = vpow.bf16 %v1647_v19  ;;  %v1394_v60 = vpop.f32.mrb[10].mxu0  ;;  %v1550_v8 = vadd.f32 %v3182_v48, %v1392_v17 }
 0x2b5   :  { %v1551_v30 = vadd.f32 %v3179_v47, %v1394_v60  ;;  %v1396_v25 = vpop.f32.mrb[11].mxu0 }
 0x2b6   :  { %v2163_v31 = vpop.eup %2162  ;;  %v1552_v15 = vadd.f32 %v3182_v48, %v1396_v25 }
 0x2b7   :  { %v2165_v6 = vpop.eup %2164  ;;  %v1609_v33 = vpack.c.bf16 %v1551_v30, %v1549_v24  ;;  %v1733_v7 = vmul.bf16 %v2163_v31, %v2691_v51 }
 0x2b8   :  { %v1610_v2 = vpack.c.bf16 %v1552_v15, %v1550_v8  ;;  %v1734_v16 = vmul.bf16 %v2165_v6, %v2700_v0 }
 0x2b9   :  { %v1650_v26 = vmul.bf16 1069105081, %v1609_v33 }
 0x2ba   :  { %v1653_v13 = vmul.bf16 1069105081, %v1610_v2  ;;  %v1400_v61 = vpop.f32.mrb[12].mxu0  ;;  %1775 = vmatprep.subr.bf16.mxu1 %v1734_v16 }
 0x2bb   :  { %2170 = vpow.bf16 %v1650_v26  ;;  %v1402_v3 = vpop.f32.mrb[13].mxu0  ;;  %1776 = vmatpush1.bf16.msra.mxu1 %v1733_v7  ;;  %v1553_v50 = vadd.f32 %v3179_v47, %v1400_v61 }
 0x2bc   :  { %2172 = vpow.bf16 %v1653_v13  ;;  %v1404_v43 = vpop.f32.mrb[14].mxu0  ;;  %v1554_v10 = vadd.f32 %v3182_v48, %v1402_v3 }
 0x2bd   :  { %v1555_v45 = vadd.f32 %v3179_v47, %v1404_v43  ;;  %v1406_v5 = vpop.f32.mrb[15].mxu0 }
 0x2be   :  { %v2167_v57 = vpop.eup %2166  ;;  %v1556_v0 = vadd.f32 %v3182_v48, %v1406_v5 }
 0x2bf   :  { %v2169_v18 = vpop.eup %2168  ;;  %v1611_v51 = vpack.c.bf16 %v1555_v45, %v1553_v50  ;;  %v1735_v17 = vmul.bf16 %v2167_v57, %v2717_v40 }
 0x2c0   :  { %v1612_v37 = vpack.c.bf16 %v1556_v0, %v1554_v10  ;;  %v1736_v19 = vmul.bf16 %v2169_v18, %v2720_v59 }
 0x2c1   :  { %v1656_v55 = vmul.bf16 1069105081, %v1611_v51 }
 0x2c2   :  { %v1659_v60 = vmul.bf16 1069105081, %v1612_v37  ;;  %v1410_v14 = vpop.f32.mrb[16].mxu0  ;;  %1777 = vmatprep.subr.bf16.mxu1 %v1736_v19 }
 0x2c3   :  { %2174 = vpow.bf16 %v1656_v55  ;;  %v1412_v24 = vpop.f32.mrb[17].mxu0  ;;  %1778 = vmatpush1.bf16.msra.mxu1 %v1735_v17  ;;  %v1557_v25 = vadd.f32 %v3179_v47, %v1410_v14 }
 0x2c4   :  { %2176 = vpow.bf16 %v1659_v60  ;;  %v1414_v30 = vpop.f32.mrb[18].mxu0  ;;  %v1558_v6 = vadd.f32 %v3182_v48, %v1412_v24 }
 0x2c5   :  { %v1559_v31 = vadd.f32 %v3179_v47, %v1414_v30  ;;  %v1416_v8 = vpop.f32.mrb[19].mxu0 }
 0x2c6   :  { %v2171_v15 = vpop.eup %2170  ;;  %v1560_v59 = vadd.f32 %v3182_v48, %v1416_v8 }
 0x2c7   :  { %v2173_v33 = vpop.eup %2172  ;;  %v1613_v40 = vpack.c.bf16 %v1559_v31, %v1557_v25  ;;  %v1737_v7 = vmul.bf16 %v2171_v15, %v2729_v52 }
 0x2c8   :  { %v1614_v2 = vpack.c.bf16 %v1560_v59, %v1558_v6  ;;  %v1738_v16 = vmul.bf16 %v2173_v33, %v2732_v12 }
 0x2c9   :  { %v1662_v26 = vmul.bf16 1069105081, %v1613_v40 }
 0x2ca   :  { %v1665_v13 = vmul.bf16 1069105081, %v1614_v2  ;;  %v1420_v61 = vpop.f32.mrb[20].mxu0  ;;  %1779 = vmatprep.subr.bf16.mxu1 %v1738_v16 }
 0x2cb   :  { %2178 = vpow.bf16 %v1662_v26  ;;  %v1422_v3 = vpop.f32.mrb[21].mxu0  ;;  %1780 = vmatpush1.bf16.msra.mxu1 %v1737_v7  ;;  %v1561_v50 = vadd.f32 %v3179_v47, %v1420_v61 }
 0x2cc   :  { %2180 = vpow.bf16 %v1665_v13  ;;  %v1424_v43 = vpop.f32.mrb[22].mxu0  ;;  %v1562_v10 = vadd.f32 %v3182_v48, %v1422_v3 }
 0x2cd   :  { %v1563_v45 = vadd.f32 %v3179_v47, %v1424_v43  ;;  %v1426_v5 = vpop.f32.mrb[23].mxu0 }
 0x2ce   :  { %v2175_v57 = vpop.eup %2174  ;;  %v1564_v12 = vadd.f32 %v3182_v48, %v1426_v5 }
 0x2cf   :  { %v2177_v0 = vpop.eup %2176  ;;  %v1615_v52 = vpack.c.bf16 %v1563_v45, %v1561_v50  ;;  %v1739_v19 = vmul.bf16 %v2175_v57, %v2741_v4 }
 0x2d0   :  { %v1616_v18 = vpack.c.bf16 %v1564_v12, %v1562_v10  ;;  %v1740_v51 = vmul.bf16 %v2177_v0, %v2744_v21 }
 0x2d1   :  { %v1668_v37 = vmul.bf16 1069105081, %v1615_v52 }
 0x2d2   :  { %v1671_v55 = vmul.bf16 1069105081, %v1616_v18  ;;  %v1430_v17 = vpop.f32.mrb[24].mxu0  ;;  %1781 = vmatprep.subr.bf16.mxu1 %v1740_v51 }
 0x2d3   :  { %2182 = vpow.bf16 %v1668_v37  ;;  %v1432_v60 = vpop.f32.mrb[25].mxu0  ;;  %1782 = vmatpush1.bf16.msra.mxu1 %v1739_v19  ;;  %v1565_v24 = vadd.f32 %v3179_v47, %v1430_v17 }
 0x2d4   :  { %2184 = vpow.bf16 %v1671_v55  ;;  %v1434_v14 = vpop.f32.mrb[26].mxu0  ;;  %v1566_v8 = vadd.f32 %v3182_v48, %v1432_v60 }
 0x2d5   :  { %v1567_v30 = vadd.f32 %v3179_v47, %v1434_v14  ;;  %v1436_v25 = vpop.f32.mrb[27].mxu0 }
 0x2d6   :  { %v2179_v31 = vpop.eup %2178  ;;  %v1568_v21 = vadd.f32 %v3182_v48, %v1436_v25 }
 0x2d7   :  { %v2181_v15 = vpop.eup %2180  ;;  %v1617_v4 = vpack.c.bf16 %v1567_v30, %v1565_v24  ;;  %v1741_v40 = vmul.bf16 %v2179_v31, %v2778_v29 }
 0x2d8   :  { %v1618_v6 = vpack.c.bf16 %v1568_v21, %v1566_v8  ;;  %v1742_v59 = vmul.bf16 %v2181_v15, %v2781_v38 }
 0x2d9   :  { %v1674_v33 = vmul.bf16 1069105081, %v1617_v4 }
 0x2da   :  { %v1677_v2 = vmul.bf16 1069105081, %v1618_v6  ;;  %v1440_v16 = vpop.f32.mrb[28].mxu0  ;;  %1783 = vmatprep.subr.bf16.mxu1 %v1742_v59 }
 0x2db   :  { %2186 = vpow.bf16 %v1674_v33  ;;  %v1442_v26 = vpop.f32.mrb[29].mxu0  ;;  %1784 = vmatpush1.bf16.msra.mxu1 %v1741_v40  ;;  %v1569_v13 = vadd.f32 %v3179_v47, %v1440_v16 }
 0x2dc   :  { %2188 = vpow.bf16 %v1677_v2  ;;  %v1444_v7 = vpop.f32.mrb[30].mxu0  ;;  %v1570_v50 = vadd.f32 %v3182_v48, %v1442_v26 }
 0x2dd   :  { %v1571_v61 = vadd.f32 %v3179_v47, %v1444_v7  ;;  %v1446_v3 = vpop.f32.mrb[31].mxu0 }
 0x2de   :  { %v2183_v43 = vpop.eup %2182  ;;  %v1572_v38 = vadd.f32 %v3182_v48, %v1446_v3 }
 0x2df   :  { %v2185_v45 = vpop.eup %2184  ;;  %v1619_v29 = vpack.c.bf16 %v1571_v61, %v1569_v13  ;;  %v1743_v12 = vmul.bf16 %v2183_v43, %v2816_v11 }
 0x2e0   :  { %v1620_v5 = vpack.c.bf16 %v1572_v38, %v1570_v50  ;;  %v1744_v57 = vmul.bf16 %v2185_v45, %v2819_v62 }
 0x2e1   :  { %v1680_v10 = vmul.bf16 1069105081, %v1619_v29 }
 0x2e2   :  { %v1683_v0 = vmul.bf16 1069105081, %v1620_v5  ;;  %v1450_v52 = vpop.f32.mrb[32].mxu0  ;;  %1785 = vmatprep.subr.bf16.mxu1 %v1744_v57 }
 0x2e3   :  { %2190 = vpow.bf16 %v1680_v10  ;;  %v1452_v18 = vpop.f32.mrb[33].mxu0  ;;  %1786 = vmatpush1.bf16.msra.mxu1 %v1743_v12  ;;  %v1573_v37 = vadd.f32 %v3179_v47, %v1450_v52 }
 0x2e4   :  { %2192 = vpow.bf16 %v1683_v0  ;;  %v1454_v51 = vpop.f32.mrb[34].mxu0  ;;  %v1574_v60 = vadd.f32 %v3182_v48, %v1452_v18 }
 0x2e5   :  { %v1575_v19 = vadd.f32 %v3179_v47, %v1454_v51  ;;  %v1456_v55 = vpop.f32.mrb[35].mxu0 }
 0x2e6   :  { %v2187_v17 = vpop.eup %2186  ;;  %v1576_v62 = vadd.f32 %v3182_v48, %v1456_v55 }
 0x2e7   :  { %v2189_v14 = vpop.eup %2188  ;;  %v1621_v11 = vpack.c.bf16 %v1575_v19, %v1573_v37  ;;  %v1745_v31 = vmul.bf16 %v2187_v17, %v2852_v27 }
 0x2e8   :  { %v1622_v24 = vpack.c.bf16 %v1576_v62, %v1574_v60  ;;  %v1746_v30 = vmul.bf16 %v2189_v14, %v2855_v39 }
 0x2e9   :  { %v1686_v25 = vmul.bf16 1069105081, %v1621_v11 }
 0x2ea   :  { %v1689_v8 = vmul.bf16 1069105081, %v1622_v24  ;;  %v1460_v21 = vpop.f32.mrb[36].mxu0  ;;  %1787 = vmatprep.subr.bf16.mxu1 %v1746_v30 }
 0x2eb   :  { %2194 = vpow.bf16 %v1686_v25  ;;  %v1462_v15 = vpop.f32.mrb[37].mxu0  ;;  %1788 = vmatpush1.bf16.msra.mxu1 %v1745_v31  ;;  %v1577_v6 = vadd.f32 %v3179_v47, %v1460_v21 }
 0x2ec   :  { %2196 = vpow.bf16 %v1689_v8  ;;  %v1464_v4 = vpop.f32.mrb[38].mxu0  ;;  %v1578_v2 = vadd.f32 %v3182_v48, %v1462_v15 }
 0x2ed   :  { %v1579_v59 = vadd.f32 %v3179_v47, %v1464_v4  ;;  %v1466_v33 = vpop.f32.mrb[39].mxu0 }
 0x2ee   :  { %v2191_v40 = vpop.eup %2190  ;;  %v1580_v39 = vadd.f32 %v3182_v48, %v1466_v33 }
 0x2ef   :  { %v2193_v16 = vpop.eup %2192  ;;  %v1623_v27 = vpack.c.bf16 %v1579_v59, %v1577_v6  ;;  %v1747_v61 = vmul.bf16 %v2191_v40, %v2883_v1 }
 0x2f0   :  { %v1624_v26 = vpack.c.bf16 %v1580_v39, %v1578_v2  ;;  %v1748_v7 = vmul.bf16 %v2193_v16, %v2886_v49 }
 0x2f1   :  { %v1692_v13 = vmul.bf16 1069105081, %v1623_v27 }
 0x2f2   :  { %v1695_v3 = vmul.bf16 1069105081, %v1624_v26  ;;  %v1470_v43 = vpop.f32.mrb[40].mxu0  ;;  %1789 = vmatprep.subr.bf16.mxu1 %v1748_v7 }
 0x2f3   :  { %2198 = vpow.bf16 %v1692_v13  ;;  %v1472_v50 = vpop.f32.mrb[41].mxu0  ;;  %1790 = vmatpush1.bf16.msra.mxu1 %v1747_v61  ;;  %v1581_v45 = vadd.f32 %v3179_v47, %v1470_v43 }
 0x2f4   :  { %2200 = vpow.bf16 %v1695_v3  ;;  %v1474_v38 = vpop.f32.mrb[42].mxu0  ;;  %v1582_v10 = vadd.f32 %v3182_v48, %v1472_v50 }
 0x2f5   :  { %v1583_v29 = vadd.f32 %v3179_v47, %v1474_v38  ;;  %v1476_v5 = vpop.f32.mrb[43].mxu0 }
 0x2f6   :  { %v2195_v57 = vpop.eup %2194  ;;  %v1584_v49 = vadd.f32 %v3182_v48, %v1476_v5 }
 0x2f7   :  { %v2197_v12 = vpop.eup %2196  ;;  %v1625_v1 = vpack.c.bf16 %v1583_v29, %v1581_v45  ;;  %v1749_v51 = vmul.bf16 %v2195_v57, %v2913_v9 }
 0x2f8   :  { %v1626_v0 = vpack.c.bf16 %v1584_v49, %v1582_v10  ;;  %v1750_v52 = vmul.bf16 %v2197_v12, %v2916_v35  ;;  %v2256_v12 = vmov 1966171168  }
 0x2f9   :  { %v1698_v18 = vmul.bf16 1069105081, %v1625_v1  ;;  %v1825_v1 = vunpack.c.l.s4 %v2256_v12 }
 0x2fa   :  { %v1701_v37 = vmul.bf16 1069105081, %v1626_v0  ;;  %v1480_v19 = vpop.f32.mrb[44].mxu0  ;;  %1791 = vmatprep.subr.bf16.mxu1 %v1750_v52 }
 0x2fb   :  { %2202 = vpow.bf16 %v1698_v18  ;;  %v1482_v55 = vpop.f32.mrb[45].mxu0  ;;  %1792 = vmatpush1.bf16.msra.mxu1 %v1749_v51  ;;  %v1585_v60 = vadd.f32 %v3179_v47, %v1480_v19 }
 0x2fc   :  { %2204 = vpow.bf16 %v1701_v37  ;;  %v1484_v17 = vpop.f32.mrb[46].mxu0  ;;  %v1586_v24 = vadd.f32 %v3182_v48, %v1482_v55 }
 0x2fd   :  { %v1587_v62 = vadd.f32 %v3179_v47, %v1484_v17  ;;  %v1486_v14 = vpop.f32.mrb[47].mxu0  ;;  %v1826_v17 = vunpack.c.0.s8 %v1825_v1 }
 0x2fe   :  { %v2199_v11 = vpop.eup %2198  ;;  %v1588_v35 = vadd.f32 %v3182_v48, %v1486_v14 }
 0x2ff   :  { %v2201_v30 = vpop.eup %2200  ;;  %v1627_v9 = vpack.c.bf16 %v1587_v62, %v1585_v60  ;;  %v1751_v21 = vmul.bf16 %v2199_v11, %v2946_v42 }
 0x300   :  { %v1628_v25 = vpack.c.bf16 %v1588_v35, %v1586_v24  ;;  %v1752_v31 = vmul.bf16 %v2201_v30, %v2949_v34 }
 0x301   :  { %v1704_v8 = vmul.bf16 1069105081, %v1627_v9  ;;  %v3357_v9 = vld [vmem:[#allocation9_spill] sm:$0xff] }
 0x302   :  { %v1707_v15 = vmul.bf16 1069105081, %v1628_v25  ;;  %v1490_v4 = vpop.f32.mrb[48].mxu0  ;;  %1793 = vmatprep.subr.bf16.mxu1 %v1752_v31  ;;  %v1829_v25 = vsub.s32 %v1826_v17, %v3357_v9 }
 0x303   :  { %2206 = vpow.bf16 %v1704_v8  ;;  %v1492_v6 = vpop.f32.mrb[49].mxu0  ;;  %1794 = vmatpush1.bf16.msra.mxu1 %v1751_v21  ;;  %v1589_v33 = vadd.f32 %v3179_v47, %v1490_v4 }
 0x304   :  { %2208 = vpow.bf16 %v1707_v15  ;;  %v1494_v59 = vpop.f32.mrb[50].mxu0  ;;  %v1590_v16 = vadd.f32 %v3182_v48, %v1492_v6 }
 0x305   :  { %v1591_v40 = vadd.f32 %v3179_v47, %v1494_v59  ;;  %v1496_v2 = vpop.f32.mrb[51].mxu0 }
 0x306   :  { %v2203_v39 = vpop.eup %2202  ;;  %v1592_v34 = vadd.f32 %v3182_v48, %v1496_v2 }
 0x307   :  { %v2205_v27 = vpop.eup %2204  ;;  %v1629_v42 = vpack.c.bf16 %v1591_v40, %v1589_v33  ;;  %v1753_v61 = vmul.bf16 %v2203_v39, %v2976_v36  ;;  %v1859_v33 = vrot.slane %v3089_v63, %v1829_v25 }
 0x308   :  { %v1630_v26 = vpack.c.bf16 %v1592_v34, %v1590_v16  ;;  %v1754_v7 = vmul.bf16 %v2205_v27, %v2979_v20 }
 0x309   :  { %v1710_v13 = vmul.bf16 1069105081, %v1629_v42 }
 0x30a   :  { %v1713_v3 = vmul.bf16 1069105081, %v1630_v26  ;;  %v1500_v43 = vpop.f32.mrb[52].mxu0  ;;  %1795 = vmatprep.subr.bf16.mxu1 %v1754_v7  ;;  %v1860_v7 = vcombine.high %v1859_v33, %v1859_v33 }
 0x30b   :  { %2210 = vpow.bf16 %v1710_v13  ;;  %v1502_v50 = vpop.f32.mrb[53].mxu0  ;;  %1796 = vmatpush1.bf16.msra.mxu1 %v1753_v61  ;;  %v1593_v45 = vadd.f32 %v3179_v47, %v1500_v43 }
 0x30c   :  { %2212 = vpow.bf16 %v1713_v3  ;;  %v1504_v38 = vpop.f32.mrb[54].mxu0  ;;  %v1594_v10 = vadd.f32 %v3182_v48, %v1502_v50 }
 0x30d   :  { %v1595_v29 = vadd.f32 %v3179_v47, %v1504_v38  ;;  %v1506_v5 = vpop.f32.mrb[55].mxu0 }
 0x30e   :  { %v2207_v57 = vpop.eup %2206  ;;  %v1596_v20 = vadd.f32 %v3182_v48, %v1506_v5 }
 0x30f   :  { %v2209_v49 = vpop.eup %2208  ;;  %v1631_v36 = vpack.c.bf16 %v1595_v29, %v1593_v45  ;;  %v1755_v51 = vmul.bf16 %v2207_v57, %v3002_v53  ;;  %v1867_v45 = vrot.slane %v1860_v7, %v1829_v25 }
 0x310   :  { %v1632_v0 = vpack.c.bf16 %v1596_v20, %v1594_v10  ;;  %v1756_v52 = vmul.bf16 %v2209_v49, %v3005_v28 }
 0x311   :  { %v1716_v18 = vmul.bf16 1069105081, %v1631_v36  ;;  %v1868_v20 = vcombine.high %v1867_v45, %v1867_v45 }
 0x312   :  { %v1719_v37 = vmul.bf16 1069105081, %v1632_v0  ;;  %v1510_v19 = vpop.f32.mrb[56].mxu0  ;;  %1797 = vmatprep.subr.bf16.mxu1 %v1756_v52 }
 0x313   :  { %2214 = vpow.bf16 %v1716_v18  ;;  %v1512_v55 = vpop.f32.mrb[57].mxu0  ;;  %1798 = vmatpush1.bf16.msra.mxu1 %v1755_v51  ;;  %v1597_v62 = vadd.f32 %v3179_v47, %v1510_v19  ;;  %v1923_v18 = vcombine.low %v3195_v46, %v3195_v46 }
 0x314   :  { %2216 = vpow.bf16 %v1719_v37  ;;  %v1514_v60 = vpop.f32.mrb[58].mxu0  ;;  %v1598_v28 = vadd.f32 %v3182_v48, %v1512_v55 }
 0x315   :  { %v1599_v14 = vadd.f32 %v3179_v47, %v1514_v60  ;;  %v1516_v11 = vpop.f32.mrb[59].mxu0 }
 0x316   :  { %v2211_v24 = vpop.eup %2210  ;;  %v1600_v35 = vadd.f32 %v3182_v48, %v1516_v11 }
 0x317   :  { %v2213_v53 = vpop.eup %2212  ;;  %v1633_v30 = vpack.c.bf16 %v1599_v14, %v1597_v62  ;;  %v1757_v15 = vmul.bf16 %v2211_v24, %v3045_v44 }
 0x318   :  { %v1634_v31 = vpack.c.bf16 %v1600_v35, %v1598_v28  ;;  %v1758_v8 = vmul.bf16 %v2213_v53, %v3049_v54 }
 0x319   :  { %v1722_v21 = vmul.bf16 1069105081, %v1633_v30 }
 0x31a   :  { %v1725_v4 = vmul.bf16 1069105081, %v1634_v31  ;;  %v1520_v6 = vpop.f32.mrb[60].mxu0  ;;  %1799 = vmatprep.subr.bf16.mxu1 %v1758_v8 }
 0x31b   :  { %2218 = vpow.bf16 %v1722_v21  ;;  %v1522_v59 = vpop.f32.mrb[61].mxu0  ;;  %1800 = vmatpush1.bf16.msra.mxu1 %v1757_v15  ;;  %v1601_v2 = vadd.f32 %v3179_v47, %v1520_v6 }
 0x31c   :  { %2220 = vpow.bf16 %v1725_v4  ;;  %v1524_v40 = vpop.f32.mrb[62].mxu0  ;;  %v1602_v54 = vadd.f32 %v3182_v48, %v1522_v59 }
 0x31d   :  { %v1603_v39 = vadd.f32 %v3179_v47, %v1524_v40  ;;  %v1526_v16 = vpop.f32.mrb[63].mxu0 }
 0x31e   :  { %v2215_v34 = vpop.eup %2214  ;;  %v1604_v44 = vadd.f32 %v3182_v48, %v1526_v16  ;;  %v1823_v27 = vcombine.high %v1524_v40, %v1526_v16  ;;  %v1820_v48 = vld [vmem:[#allocation2] sm:$0x3] }
 0x31f   :  { %v2217_v42 = vpop.eup %2216  ;;  %v1635_v26 = vpack.c.bf16 %v1603_v39, %v1601_v2  ;;  %v1759_v43 = vmul.bf16 %v2215_v34, %v3060_v22 }
 0x320   :  { %v1636_v13 = vpack.c.bf16 %v1604_v44, %v1602_v54  ;;  %v1830_v61 = vrot.slane %v1823_v27, %v1829_v25  ;;  %v1760_v63 = vmul.bf16 %v2217_v42, %v3063_v58 }
 0x321   :  { %v1728_v3 = vmul.bf16 1069105081, %v1635_v26 }
 0x322   :  { %v1731_v50 = vmul.bf16 1069105081, %v1636_v13  ;;  %v1831_v38 = vcombine.high %v1830_v61, %v1830_v61  ;;  %1801 = vmatprep.subr.bf16.mxu1 %v1760_v63 }
 0x323   :  { %2222 = vpow.bf16 %v1728_v3  ;;  %1802 = vmatpush1.bf16.msra.mxu1 %v1759_v43 }
 0x324   :  { %2224 = vpow.bf16 %v1731_v50  ;;  %v1838_v47 = vrot.slane %v1831_v38, %v1829_v25 }
 0x326   :  { %v2219_v29 = vpop.eup %2218  ;;  %v1839_v5 = vcombine.high %v1838_v47, %v1838_v47 }
 0x327   :  { %v2221_v57 = vpop.eup %2220  ;;  %v1761_v58 = vmul.bf16 %v2219_v29, %v3068_v56 }
 0x328   :  { %v1841_v10 = vadd.f32 %v1839_v5, %v1820_v48  ;;  %v1762_v49 = vmul.bf16 %v2221_v57, %v3071_v32 }
 0x32a   :  { %v1870_v36 = vadd.f32 %v1868_v20, %v1841_v10  ;;  %1803 = vmatprep.subr.bf16.mxu1 %v1762_v49 }
 0x32b   :  { %1804 = vmatpush1.bf16.msra.mxu1 %v1761_v58 }
 0x32c   :  { %1875 = vst.msk [vmem:[#allocation2] sm:$0x3] %vm2452_vm0, %v1870_v36 }
 0x32e   :  { %v2223_v12 = vpop.eup %2222 }
 0x32f   :  { %v2225_v1 = vpop.eup %2224  ;;  %v1763_v52 = vmul.bf16 %v2223_v12, %v3076_v23 }
 0x330   :  { %v1764_v0 = vmul.bf16 %v2225_v1, %v3079_v41 }
 0x332   :  { %1805 = vmatprep.subr.bf16.mxu1 %v1764_v0 }
 0x333   :  { %1806 = vmatpush1.bf16.msra.mxu1 %v1763_v52 }
 0x336   :  { %1808 = vmatmul.mubr.bf16.vlgmr.msra.gmra.mrb[0].mxu1 %v1923_v18 }
 0x409   :  { %v1809_v56 = vpop.f32.mrb[0].mxu1 }
 0x40a   :  { %v1811_v32 = vpop.f32.mrb[1].mxu1  ;;  %1818 = vst [vmem:[#allocation3] sm:$0xff] %v1809_v56 }
 0x40b   :  { %v1813_v51 = vpop.f32.mrb[2].mxu1  ;;  %1819 = vst [vmem:[#allocation3 + $0x8] sm:$0xff] %v1811_v32 }
 0x40c   :  { %v1814_v37 = vpop.f32.mrb[3].mxu1 }
 0x40d   :  { %2237 = shalt.err (!%p2234_p4)
}
 0x40e   :  { %s2238_s16 = scalar_lea.hbm %s3309_s4, 256 }
 0x40f   :  { %p2239_p5 = scmp.ne.s32.totalorder %s3309_s4, %s2238_s16  ;;  %p2242_p6 = scmp.lt.u32.totalorder %s2238_s16, %s3309_s4 }
 0x411   :  { %p2244_p7 = pnand %p2242_p6, %p2239_p5 }
 0x413   :  { %2247 = shalt.err (!%p2244_p7)
}
 0x414   :  { %1885 = dma.vmem_to_hbm [thread:$0]  %s1883_s12, 256, %s3309_s4, [#allocation4]  }
 0x415   :  { %2248 = dma.done.wait [#allocation4], 256  }
 0x416   :  { %2249 = vsyncadd [#allocation4], 4294967040 }
 0x417   :  { %1889 = vsyncpa [#allocation4], 1 }

</bundles_post_ra>
